<compile_context>
chip_gen: v5e
topology: v5e:2x2
jax: 0.10.0
libtpu: 0.0.40
codegen_flags: <defaults>
</compile_context>

<pallas_src>
import functools

import jax
import jax.numpy as jnp
from jax.experimental import pallas as pl
from jax.experimental.pallas import tpu as pltpu

SELU_ALPHA = 1.6732632423543772
SELU_SCALE = 1.0507009873554805
LANES = 128


def _selu(x):
    return SELU_SCALE * jnp.where(x > 0, x, SELU_ALPHA * (jnp.exp(x) - 1.0))


def _round_up(x, m):
    return (x + m - 1) // m * m


def critic_kernel(idx_ref, srow_ref, state_ref,
                  wloop_ref, bloop_ref,
                  wr1_ref, wr2_ref, bread_ref,
                  out_ref, *, t):
    f32 = jnp.float32
    state = state_ref[...]                                    # [E, Fp]
    E, Fp = state.shape
    P = idx_ref.shape[0]
    Rp = wr1_ref.shape[1]

    # ---- one-hot gather / scatter matrices (per graph) ----
    first = idx_ref[:, 0:1]                                   # [P, 1]
    second = idx_ref[:, 1:2]                                  # [P, 1]
    iota_pe = jax.lax.broadcasted_iota(jnp.int32, (P, E), 1)
    sel_first = (iota_pe == first).astype(f32)                # [P, E]
    sel_second = (iota_pe == second).astype(f32)              # [P, E]
    iota_ep = jax.lax.broadcasted_iota(jnp.int32, (E, P), 0)
    sel_scatter = (srow_ref[...] == iota_ep).astype(f32)      # [E, P] scatter-add by `second`

    # ---- packed loop weights / biases; all slices start at lane multiples of 128 ----
    w_mh = wloop_ref[:, 0:5 * Fp]                             # [Fp,5Fp]: wma|wmb|whr|whz|whn
    w_i = wloop_ref[:, 5 * Fp:8 * Fp]                         # [Fp,3Fp]: wir|wiz|win
    b_mh = jnp.broadcast_to(bloop_ref[:, 0:5 * Fp], (E, 5 * Fp))    # [bm | 0 | 0 | 0 | bhn]
    b_i = jnp.broadcast_to(bloop_ref[:, 5 * Fp:8 * Fp], (E, 3 * Fp))  # [bir+bhr | biz+bhz | bin]

    # t is a small static int -> unrolled.
    # TODO(synk): switch to lax.fori_loop carrying `state` if t / Fp grow large.
    # TODO(synk): cast MXU operands to bf16 (keep f32 accum + f32 VPU/EUP math)
    #             once E / batch make this MXU-bound; irrelevant at these sizes.
    for _ in range(t):
        # One wide matmul: state @ [wma|wmb|whr|whz|whn]  (+ folded biases).
        mh = jnp.dot(state, w_mh, preferred_element_type=f32) + b_mh            # [E, 5Fp]
        # Message MLP fused with both gathers (project-then-gather):
        #   m = selu(state[first]@wma + bm + state[second]@wmb)
        m = _selu(jnp.dot(sel_first, mh[:, 0:Fp], preferred_element_type=f32)
                  + jnp.dot(sel_second, mh[:, Fp:2 * Fp],
                            preferred_element_type=f32))                        # [P, Fp]
        # scatter_add_(0, second, m)  ==  one-hot @ m
        msum = jnp.dot(sel_scatter, m, preferred_element_type=f32)              # [E, Fp]
        # GRUCell(msum, state); input-side gates fused into one matmul,
        # hidden-side gates were already computed inside `mh`.
        gi = jnp.dot(msum, w_i, preferred_element_type=f32) + b_i               # [E, 3Fp]
        r = jax.nn.sigmoid(gi[:, 0:Fp] + mh[:, 2 * Fp:3 * Fp])
        z = jax.nn.sigmoid(gi[:, Fp:2 * Fp] + mh[:, 3 * Fp:4 * Fp])
        n = jnp.tanh(gi[:, 2 * Fp:3 * Fp] + r * mh[:, 4 * Fp:5 * Fp])
        state = (1.0 - z) * n + z * state

    # readout: give the MXU an E-row LHS (row-sum commutes with the matmul) ...
    h = jnp.sum(jnp.dot(state, wr1_ref[...], preferred_element_type=f32),
                axis=0, keepdims=True)                                           # [1, Rp]
    h = _selu(h + bread_ref[:, 0:Rp])
    h = _selu(jnp.dot(h, wr2_ref[...], preferred_element_type=f32)
              + bread_ref[:, Rp:2 * Rp])
    # ... and keep the final R->1 layer off the MXU: VPU dot product.
    wo_row = bread_ref[:, 2 * Rp:3 * Rp]
    bo = bread_ref[:, 3 * Rp:3 * Rp + 1]
    val = jnp.sum(h * wo_row, axis=1, keepdims=True) + bo                        # [1, 1]
    # lane-dense (unmasked) store of the per-graph scalar.
    out_ref[...] = jnp.broadcast_to(val, out_ref.shape)


def critic_forward(link_state, first, second, params, *, t):
    """Batched forward: link_state [B,E,F], first/second [B,P] -> [B] values."""
    f32 = jnp.float32
    B, E, F = link_state.shape
    P = first.shape[1]
    R = params["wr1"].shape[1]
    Fp = _round_up(F, LANES)
    Rp = _round_up(R, LANES)

    first = first.astype(jnp.int32)
    second = second.astype(jnp.int32)
    idx_col = jnp.stack([first, second], axis=2)                     # [B, P, 2]
    second_row = second.reshape(B, 1, P)                             # [B, 1, P]

    state = jnp.zeros((B, E, Fp), f32).at[:, :, :F].set(link_state.astype(f32))

    def padw(w):
        r, c = w.shape
        return (jnp.zeros((_round_up(r, LANES), _round_up(c, LANES)), f32)
                .at[:r, :c].set(w.astype(f32)))

    def padb(b, cols):
        return jnp.zeros((1, cols), f32).at[:, :b.shape[1]].set(b.astype(f32))

    zblk = jnp.zeros((1, Fp), f32)
    # Loop weights packed along lanes, each gate block lane-padded to Fp:
    #   [wma|wmb|whr|whz|whn | wir|wiz|win] -> [Fp, 8Fp]
    w_loop = jnp.concatenate(
        [padw(params["wma"]), padw(params["wmb"]), padw(params["whr"]),
         padw(params["whz"]), padw(params["whn"]),
         padw(params["wir"]), padw(params["wiz"]), padw(params["win"])], axis=1)
    # Loop biases, pre-summed / folded:
    #   b_mh = [bm | 0 | 0 | 0 | bhn]  (bhn stays with whn because of the r* term)
    #   b_i  = [bir+bhr | biz+bhz | bin]
    b_loop = jnp.concatenate(
        [padb(params["bm"], Fp), zblk, zblk, zblk, padb(params["bhn"], Fp),
         padb(params["bir"] + params["bhr"], Fp),
         padb(params["biz"] + params["bhz"], Fp),
         padb(params["bin"], Fp)], axis=1)                            # [1, 8Fp]
    wr1 = padw(params["wr1"])                                         # [Fp, Rp]
    wr2 = padw(params["wr2"])                                         # [Rp, Rp]
    b_read = jnp.concatenate(
        [padb(params["br1"], Rp), padb(params["br2"], Rp),
         padb(params["wo"].T, Rp), padb(params["bo"], Rp)], axis=1)   # [1, 4Rp]

    args = (idx_col, second_row, state, w_loop, b_loop, wr1, wr2, b_read)

    # Per-graph blocks (leading batch dim squeezed) + batch-invariant weight blocks.
    in_specs = [
        pl.BlockSpec((None, P, 2), lambda b: (b, 0, 0)),
        pl.BlockSpec((None, 1, P), lambda b: (b, 0, 0)),
        pl.BlockSpec((None, E, Fp), lambda b: (b, 0, 0)),
        pl.BlockSpec((Fp, 8 * Fp), lambda b: (0, 0)),
        pl.BlockSpec((1, 8 * Fp), lambda b: (0, 0)),
        pl.BlockSpec((Fp, Rp), lambda b: (0, 0)),
        pl.BlockSpec((Rp, Rp), lambda b: (0, 0)),
        pl.BlockSpec((1, 4 * Rp), lambda b: (0, 0)),
    ]
    out_specs = pl.BlockSpec((None, 1, LANES), lambda b: (b, 0, 0))

    # Advisory cost estimate (kernel is launch-bound; helps XLA scheduling only).
    flops_loop = 2 * E * Fp * 8 * Fp + 4 * P * E * Fp + 2 * E * P * Fp + 12 * E * Fp
    flops_read = 2 * E * Fp * Rp + 2 * Rp * Rp + 4 * Rp
    flops = B * (t * flops_loop + flops_read)
    transcendentals = B * (t * (P * Fp + 3 * E * Fp) + 2 * Rp)
    bytes_accessed = sum(a.size * a.dtype.itemsize for a in args) + B * LANES * 4

    out = pl.pallas_call(
        functools.partial(critic_kernel, t=t),
        out_shape=jax.ShapeDtypeStruct((B, 1, LANES), f32),
        grid=(B,),
        in_specs=in_specs,
        out_specs=out_specs,
        compiler_params=pltpu.CompilerParams(
            dimension_semantics=("parallel",)),
        cost_estimate=pl.CostEstimate(flops=flops,
                                      transcendentals=transcendentals,
                                      bytes_accessed=bytes_accessed),
    )(*args)
    return out[:, 0, 0]                                               # [B]


def init_params(key, feature_size, readout_units):
    # Deterministic synthetic init (same shapes as the PyTorch __init__;
    # note: the module zeroes out_layer.weight — we keep it random so the
    # whole compute path is exercised).
    F, R = feature_size, readout_units
    ks = jax.random.split(key, 16)
    s = 0.1

    def w(k, shape):
        return (s * jax.random.normal(k, shape)).astype(jnp.float32)

    params = {
        # message: Linear(2F -> F); transposed & split into the two F-blocks
        "wma": w(ks[0], (F, F)), "wmb": w(ks[1], (F, F)), "bm": w(ks[2], (1, F)),
        # GRUCell: each gate [F, F] (transposed), torch gate order r, z, n
        "wir": w(ks[3], (F, F)), "wiz": w(ks[4], (F, F)), "win": w(ks[5], (F, F)),
        "whr": w(ks[6], (F, F)), "whz": w(ks[7], (F, F)), "whn": w(ks[8], (F, F)),
        "bir": w(ks[9], (1, F)), "biz": w(ks[10], (1, F)), "bin": w(ks[11], (1, F)),
        "bhr": jnp.zeros((1, F), jnp.float32),
        "bhz": jnp.zeros((1, F), jnp.float32),
        "bhn": jnp.zeros((1, F), jnp.float32),
        # readout: Linear(F->R), Linear(R->R); out_layer: Linear(R->1)
        "wr1": w(ks[12], (F, R)), "br1": jnp.zeros((1, R), jnp.float32),
        "wr2": w(ks[13], (R, R)), "br2": jnp.zeros((1, R), jnp.float32),
        "wo": w(ks[14], (R, 1)), "bo": w(ks[15], (1, 1)),
    }
    return params


def critic_ref(link_state, first, second, params, *, t):
    # Pure-JAX reference (single graph) matching the PyTorch forward.
    state = link_state
    for _ in range(t):
        main = state[first]
        neigh = state[second]
        m = _selu(main @ params["wma"] + neigh @ params["wmb"] + params["bm"][0])
        msum = jnp.zeros_like(state).at[second].add(m)
        r = jax.nn.sigmoid(msum @ params["wir"] + params["bir"][0]
                           + state @ params["whr"] + params["bhr"][0])
        z = jax.nn.sigmoid(msum @ params["wiz"] + params["biz"][0]
                           + state @ params["whz"] + params["bhz"][0])
        n = jnp.tanh(msum @ params["win"] + params["bin"][0]
                     + r * (state @ params["whn"] + params["bhn"][0]))
        state = (1.0 - z) * n + z * state
    feature = jnp.sum(state, axis=0)
    h = _selu(feature @ params["wr1"] + params["br1"][0])
    h = _selu(h @ params["wr2"] + params["br2"][0])
    return h @ params["wo"] + params["bo"][0]


if __name__ == "__main__":
    feature_size, readout_units, t = 20, 20, 4
    B, E, P = 4, 8, 12    # batch of graphs, edges, edge pairs

    key = jax.random.PRNGKey(0)
    k_state, k_first, k_second, k_params = jax.random.split(key, 4)
    link_state = jax.random.normal(k_state, (B, E, feature_size), jnp.float32)
    first = jax.random.randint(k_first, (B, P), 0, E, jnp.int32)
    second = jax.random.randint(k_second, (B, P), 0, E, jnp.int32)
    params = init_params(k_params, feature_size, readout_units)

    forward = jax.jit(functools.partial(critic_forward, t=t))
    out = forward(link_state, first, second, params)
    jax.block_until_ready(out)

    ref = jnp.stack([critic_ref(link_state[b], first[b], second[b], params, t=t)[0]
                     for b in range(B)])
    assert out.shape == (B,)
    assert jnp.allclose(out, ref, atol=2e-4, rtol=2e-4), (out, ref)
    print("KERNEL_OK")
</pallas_src>

<mosaic_0001>
module attributes {stable_mosaic.version = 11 : i64} {
  func.func @critic_kernel(%arg0: i32, %arg1: memref<1x12x2xi32, #tpu.memory_space<vmem>>, %arg2: memref<1x1x12xi32, #tpu.memory_space<vmem>>, %arg3: memref<1x8x128xf32, #tpu.memory_space<vmem>>, %arg4: memref<128x1024xf32, #tpu.memory_space<vmem>>, %arg5: memref<1x1024xf32, #tpu.memory_space<vmem>>, %arg6: memref<128x128xf32, #tpu.memory_space<vmem>>, %arg7: memref<128x128xf32, #tpu.memory_space<vmem>>, %arg8: memref<1x512xf32, #tpu.memory_space<vmem>>, %arg9: memref<1x1x128xf32, #tpu.memory_space<vmem>>) attributes {dimension_semantics = [#tpu.dimension_semantics<parallel>], iteration_bounds = array<i64: 4>, scalar_prefetch = 0 : i64, scratch_operands = 0 : i64, tpu.core_type = #tpu.core_type<tc>, window_params = [{transform_indices = @transform_0, window_bounds = array<i64: 1, 12, 2>}, {transform_indices = @transform_1, window_bounds = array<i64: 1, 1, 12>}, {transform_indices = @transform_2, window_bounds = array<i64: 1, 8, 128>}, {pipeline_mode = #tpu.pipeline_mode<synchronous>, transform_indices = @transform_3, window_bounds = array<i64: 128, 1024>}, {pipeline_mode = #tpu.pipeline_mode<synchronous>, transform_indices = @transform_4, window_bounds = array<i64: 1, 1024>}, {pipeline_mode = #tpu.pipeline_mode<synchronous>, transform_indices = @transform_5, window_bounds = array<i64: 128, 128>}, {pipeline_mode = #tpu.pipeline_mode<synchronous>, transform_indices = @transform_6, window_bounds = array<i64: 128, 128>}, {pipeline_mode = #tpu.pipeline_mode<synchronous>, transform_indices = @transform_7, window_bounds = array<i64: 1, 512>}, {transform_indices = @transform_8, window_bounds = array<i64: 1, 1, 128>}]} {
    %c0 = arith.constant 0 : index
    %c0_0 = arith.constant 0 : index
    %c0_1 = arith.constant 0 : index
    %0 = vector.load %arg3[%c0, %c0_0, %c0_1] : memref<1x8x128xf32, #tpu.memory_space<vmem>>, vector<1x8x128xf32>
    %1 = vector.shape_cast %0 : vector<1x8x128xf32> to vector<8x128xf32>
    %c0_2 = arith.constant 0 : index
    %c0_3 = arith.constant 0 : index
    %c0_4 = arith.constant 0 : index
    %2 = vector.load %arg1[%c0_2, %c0_3, %c0_4] : memref<1x12x2xi32, #tpu.memory_space<vmem>>, vector<1x12x1xi32>
    %3 = vector.shape_cast %2 : vector<1x12x1xi32> to vector<12x1xi32>
    %c0_5 = arith.constant 0 : index
    %c0_6 = arith.constant 0 : index
    %c1 = arith.constant 1 : index
    %4 = vector.load %arg1[%c0_5, %c0_6, %c1] : memref<1x12x2xi32, #tpu.memory_space<vmem>>, vector<1x12x1xi32>
    %5 = vector.shape_cast %4 : vector<1x12x1xi32> to vector<12x1xi32>
    %6 = tpu.iota {dimensions = array<i32: 1>} : vector<12x8xi32>
    %7 = vector.broadcast %3 : vector<12x1xi32> to vector<12x8xi32>
    %8 = arith.cmpi eq, %6, %7 : vector<12x8xi32>
    %9 = arith.extui %8 : vector<12x8xi1> to vector<12x8xi32>
    %10 = arith.sitofp %9 : vector<12x8xi32> to vector<12x8xf32>
    %11 = vector.broadcast %5 : vector<12x1xi32> to vector<12x8xi32>
    %12 = arith.cmpi eq, %6, %11 : vector<12x8xi32>
    %13 = arith.extui %12 : vector<12x8xi1> to vector<12x8xi32>
    %14 = arith.sitofp %13 : vector<12x8xi32> to vector<12x8xf32>
    %15 = tpu.iota {dimensions = array<i32: 0>} : vector<8x12xi32>
    %c0_7 = arith.constant 0 : index
    %c0_8 = arith.constant 0 : index
    %c0_9 = arith.constant 0 : index
    %16 = vector.load %arg2[%c0_7, %c0_8, %c0_9] : memref<1x1x12xi32, #tpu.memory_space<vmem>>, vector<1x1x12xi32>
    %17 = vector.shape_cast %16 : vector<1x1x12xi32> to vector<1x12xi32>
    %18 = vector.broadcast %17 : vector<1x12xi32> to vector<8x12xi32>
    %19 = arith.cmpi eq, %18, %15 : vector<8x12xi32>
    %20 = arith.extui %19 : vector<8x12xi1> to vector<8x12xi32>
    %21 = arith.sitofp %20 : vector<8x12xi32> to vector<8x12xf32>
    %c0_10 = arith.constant 0 : index
    %c0_11 = arith.constant 0 : index
    %22 = vector.load %arg4[%c0_10, %c0_11] : memref<128x1024xf32, #tpu.memory_space<vmem>>, vector<128x640xf32>
    %c0_12 = arith.constant 0 : index
    %c640 = arith.constant 640 : index
    %23 = vector.load %arg4[%c0_12, %c640] : memref<128x1024xf32, #tpu.memory_space<vmem>>, vector<128x384xf32>
    %c0_13 = arith.constant 0 : index
    %c0_14 = arith.constant 0 : index
    %24 = vector.load %arg5[%c0_13, %c0_14] : memref<1x1024xf32, #tpu.memory_space<vmem>>, vector<1x640xf32>
    %25 = vector.shape_cast %24 : vector<1x640xf32> to vector<1x640xf32>
    %26 = vector.broadcast %25 : vector<1x640xf32> to vector<8x640xf32>
    %c0_15 = arith.constant 0 : index
    %c640_16 = arith.constant 640 : index
    %27 = vector.load %arg5[%c0_15, %c640_16] : memref<1x1024xf32, #tpu.memory_space<vmem>>, vector<1x384xf32>
    %28 = vector.shape_cast %27 : vector<1x384xf32> to vector<1x384xf32>
    %29 = vector.broadcast %28 : vector<1x384xf32> to vector<8x384xf32>
    %cst = arith.constant dense<0.000000e+00> : vector<8x640xf32>
    %30 = tpu.matmul %1, %22, %cst {dimension_numbers = #tpu.dot_dimension_numbers<[1], [0], [0], [1], [0, 0, 1, 1], [], []>} : vector<8x128xf32>, vector<128x640xf32>, vector<8x640xf32> -> vector<8x640xf32>
    %31 = arith.addf %30, %26 : vector<8x640xf32>
    %32 = vector.extract_strided_slice %31 {offsets = [0, 0], sizes = [8, 128], strides = [1, 1]} : vector<8x640xf32> to vector<8x128xf32>
    %cst_17 = arith.constant dense<0.000000e+00> : vector<12x128xf32>
    %33 = tpu.matmul %10, %32, %cst_17 {dimension_numbers = #tpu.dot_dimension_numbers<[1], [0], [0], [1], [0, 0, 1, 1], [], []>} : vector<12x8xf32>, vector<8x128xf32>, vector<12x128xf32> -> vector<12x128xf32>
    %34 = vector.extract_strided_slice %31 {offsets = [0, 128], sizes = [8, 128], strides = [1, 1]} : vector<8x640xf32> to vector<8x128xf32>
    %cst_18 = arith.constant dense<0.000000e+00> : vector<12x128xf32>
    %35 = tpu.matmul %14, %34, %cst_18 {dimension_numbers = #tpu.dot_dimension_numbers<[1], [0], [0], [1], [0, 0, 1, 1], [], []>} : vector<12x8xf32>, vector<8x128xf32>, vector<12x128xf32> -> vector<12x128xf32>
    %36 = arith.addf %33, %35 : vector<12x128xf32>
    %cst_19 = arith.constant 0.000000e+00 : f32
    %37 = vector.broadcast %cst_19 : f32 to vector<12x128xf32>
    %38 = arith.cmpf ogt, %36, %37 : vector<12x128xf32>
    %39 = math.exp %36 : vector<12x128xf32>
    %cst_20 = arith.constant 1.000000e+00 : f32
    %40 = vector.broadcast %cst_20 : f32 to vector<12x128xf32>
    %41 = arith.subf %39, %40 : vector<12x128xf32>
    %cst_21 = arith.constant 1.67326319 : f32
    %42 = vector.broadcast %cst_21 : f32 to vector<12x128xf32>
    %43 = arith.mulf %42, %41 : vector<12x128xf32>
    %44 = arith.select %38, %36, %43 : vector<12x128xi1>, vector<12x128xf32>
    %cst_22 = arith.constant 1.05070102 : f32
    %45 = vector.broadcast %cst_22 : f32 to vector<12x128xf32>
    %46 = arith.mulf %45, %44 : vector<12x128xf32>
    %cst_23 = arith.constant dense<0.000000e+00> : vector<8x128xf32>
    %47 = tpu.matmul %21, %46, %cst_23 {dimension_numbers = #tpu.dot_dimension_numbers<[1], [0], [0], [1], [0, 0, 1, 1], [], []>} : vector<8x12xf32>, vector<12x128xf32>, vector<8x128xf32> -> vector<8x128xf32>
    %cst_24 = arith.constant dense<0.000000e+00> : vector<8x384xf32>
    %48 = tpu.matmul %47, %23, %cst_24 {dimension_numbers = #tpu.dot_dimension_numbers<[1], [0], [0], [1], [0, 0, 1, 1], [], []>} : vector<8x128xf32>, vector<128x384xf32>, vector<8x384xf32> -> vector<8x384xf32>
    %49 = arith.addf %48, %29 : vector<8x384xf32>
    %50 = vector.extract_strided_slice %49 {offsets = [0, 0], sizes = [8, 128], strides = [1, 1]} : vector<8x384xf32> to vector<8x128xf32>
    %51 = vector.extract_strided_slice %31 {offsets = [0, 256], sizes = [8, 128], strides = [1, 1]} : vector<8x640xf32> to vector<8x128xf32>
    %52 = arith.addf %50, %51 : vector<8x128xf32>
    %53 = arith.negf %52 : vector<8x128xf32>
    %54 = math.exp %53 : vector<8x128xf32>
    %cst_25 = arith.constant 1.000000e+00 : f32
    %55 = vector.broadcast %cst_25 : f32 to vector<8x128xf32>
    %56 = arith.addf %55, %54 : vector<8x128xf32>
    %57 = arith.divf %55, %56 : vector<8x128xf32>
    %58 = vector.extract_strided_slice %49 {offsets = [0, 128], sizes = [8, 128], strides = [1, 1]} : vector<8x384xf32> to vector<8x128xf32>
    %59 = vector.extract_strided_slice %31 {offsets = [0, 384], sizes = [8, 128], strides = [1, 1]} : vector<8x640xf32> to vector<8x128xf32>
    %60 = arith.addf %58, %59 : vector<8x128xf32>
    %61 = arith.negf %60 : vector<8x128xf32>
    %62 = math.exp %61 : vector<8x128xf32>
    %cst_26 = arith.constant 1.000000e+00 : f32
    %63 = vector.broadcast %cst_26 : f32 to vector<8x128xf32>
    %64 = arith.addf %63, %62 : vector<8x128xf32>
    %65 = arith.divf %63, %64 : vector<8x128xf32>
    %66 = vector.extract_strided_slice %49 {offsets = [0, 256], sizes = [8, 128], strides = [1, 1]} : vector<8x384xf32> to vector<8x128xf32>
    %67 = vector.extract_strided_slice %31 {offsets = [0, 512], sizes = [8, 128], strides = [1, 1]} : vector<8x640xf32> to vector<8x128xf32>
    %68 = arith.mulf %57, %67 : vector<8x128xf32>
    %69 = arith.addf %66, %68 : vector<8x128xf32>
    %70 = math.tanh %69 : vector<8x128xf32>
    %cst_27 = arith.constant 1.000000e+00 : f32
    %71 = vector.broadcast %cst_27 : f32 to vector<8x128xf32>
    %72 = arith.subf %71, %65 : vector<8x128xf32>
    %73 = arith.mulf %72, %70 : vector<8x128xf32>
    %74 = arith.mulf %65, %1 : vector<8x128xf32>
    %75 = arith.addf %73, %74 : vector<8x128xf32>
    %cst_28 = arith.constant dense<0.000000e+00> : vector<8x640xf32>
    %76 = tpu.matmul %75, %22, %cst_28 {dimension_numbers = #tpu.dot_dimension_numbers<[1], [0], [0], [1], [0, 0, 1, 1], [], []>} : vector<8x128xf32>, vector<128x640xf32>, vector<8x640xf32> -> vector<8x640xf32>
    %77 = arith.addf %76, %26 : vector<8x640xf32>
    %78 = vector.extract_strided_slice %77 {offsets = [0, 0], sizes = [8, 128], strides = [1, 1]} : vector<8x640xf32> to vector<8x128xf32>
    %cst_29 = arith.constant dense<0.000000e+00> : vector<12x128xf32>
    %79 = tpu.matmul %10, %78, %cst_29 {dimension_numbers = #tpu.dot_dimension_numbers<[1], [0], [0], [1], [0, 0, 1, 1], [], []>} : vector<12x8xf32>, vector<8x128xf32>, vector<12x128xf32> -> vector<12x128xf32>
    %80 = vector.extract_strided_slice %77 {offsets = [0, 128], sizes = [8, 128], strides = [1, 1]} : vector<8x640xf32> to vector<8x128xf32>
    %cst_30 = arith.constant dense<0.000000e+00> : vector<12x128xf32>
    %81 = tpu.matmul %14, %80, %cst_30 {dimension_numbers = #tpu.dot_dimension_numbers<[1], [0], [0], [1], [0, 0, 1, 1], [], []>} : vector<12x8xf32>, vector<8x128xf32>, vector<12x128xf32> -> vector<12x128xf32>
    %82 = arith.addf %79, %81 : vector<12x128xf32>
    %cst_31 = arith.constant 0.000000e+00 : f32
    %83 = vector.broadcast %cst_31 : f32 to vector<12x128xf32>
    %84 = arith.cmpf ogt, %82, %83 : vector<12x128xf32>
    %85 = math.exp %82 : vector<12x128xf32>
    %cst_32 = arith.constant 1.000000e+00 : f32
    %86 = vector.broadcast %cst_32 : f32 to vector<12x128xf32>
    %87 = arith.subf %85, %86 : vector<12x128xf32>
    %cst_33 = arith.constant 1.67326319 : f32
    %88 = vector.broadcast %cst_33 : f32 to vector<12x128xf32>
    %89 = arith.mulf %88, %87 : vector<12x128xf32>
    %90 = arith.select %84, %82, %89 : vector<12x128xi1>, vector<12x128xf32>
    %cst_34 = arith.constant 1.05070102 : f32
    %91 = vector.broadcast %cst_34 : f32 to vector<12x128xf32>
    %92 = arith.mulf %91, %90 : vector<12x128xf32>
    %cst_35 = arith.constant dense<0.000000e+00> : vector<8x128xf32>
    %93 = tpu.matmul %21, %92, %cst_35 {dimension_numbers = #tpu.dot_dimension_numbers<[1], [0], [0], [1], [0, 0, 1, 1], [], []>} : vector<8x12xf32>, vector<12x128xf32>, vector<8x128xf32> -> vector<8x128xf32>
    %cst_36 = arith.constant dense<0.000000e+00> : vector<8x384xf32>
    %94 = tpu.matmul %93, %23, %cst_36 {dimension_numbers = #tpu.dot_dimension_numbers<[1], [0], [0], [1], [0, 0, 1, 1], [], []>} : vector<8x128xf32>, vector<128x384xf32>, vector<8x384xf32> -> vector<8x384xf32>
    %95 = arith.addf %94, %29 : vector<8x384xf32>
    %96 = vector.extract_strided_slice %95 {offsets = [0, 0], sizes = [8, 128], strides = [1, 1]} : vector<8x384xf32> to vector<8x128xf32>
    %97 = vector.extract_strided_slice %77 {offsets = [0, 256], sizes = [8, 128], strides = [1, 1]} : vector<8x640xf32> to vector<8x128xf32>
    %98 = arith.addf %96, %97 : vector<8x128xf32>
    %99 = arith.negf %98 : vector<8x128xf32>
    %100 = math.exp %99 : vector<8x128xf32>
    %cst_37 = arith.constant 1.000000e+00 : f32
    %101 = vector.broadcast %cst_37 : f32 to vector<8x128xf32>
    %102 = arith.addf %101, %100 : vector<8x128xf32>
    %103 = arith.divf %101, %102 : vector<8x128xf32>
    %104 = vector.extract_strided_slice %95 {offsets = [0, 128], sizes = [8, 128], strides = [1, 1]} : vector<8x384xf32> to vector<8x128xf32>
    %105 = vector.extract_strided_slice %77 {offsets = [0, 384], sizes = [8, 128], strides = [1, 1]} : vector<8x640xf32> to vector<8x128xf32>
    %106 = arith.addf %104, %105 : vector<8x128xf32>
    %107 = arith.negf %106 : vector<8x128xf32>
    %108 = math.exp %107 : vector<8x128xf32>
    %cst_38 = arith.constant 1.000000e+00 : f32
    %109 = vector.broadcast %cst_38 : f32 to vector<8x128xf32>
    %110 = arith.addf %109, %108 : vector<8x128xf32>
    %111 = arith.divf %109, %110 : vector<8x128xf32>
    %112 = vector.extract_strided_slice %95 {offsets = [0, 256], sizes = [8, 128], strides = [1, 1]} : vector<8x384xf32> to vector<8x128xf32>
    %113 = vector.extract_strided_slice %77 {offsets = [0, 512], sizes = [8, 128], strides = [1, 1]} : vector<8x640xf32> to vector<8x128xf32>
    %114 = arith.mulf %103, %113 : vector<8x128xf32>
    %115 = arith.addf %112, %114 : vector<8x128xf32>
    %116 = math.tanh %115 : vector<8x128xf32>
    %cst_39 = arith.constant 1.000000e+00 : f32
    %117 = vector.broadcast %cst_39 : f32 to vector<8x128xf32>
    %118 = arith.subf %117, %111 : vector<8x128xf32>
    %119 = arith.mulf %118, %116 : vector<8x128xf32>
    %120 = arith.mulf %111, %75 : vector<8x128xf32>
    %121 = arith.addf %119, %120 : vector<8x128xf32>
    %cst_40 = arith.constant dense<0.000000e+00> : vector<8x640xf32>
    %122 = tpu.matmul %121, %22, %cst_40 {dimension_numbers = #tpu.dot_dimension_numbers<[1], [0], [0], [1], [0, 0, 1, 1], [], []>} : vector<8x128xf32>, vector<128x640xf32>, vector<8x640xf32> -> vector<8x640xf32>
    %123 = arith.addf %122, %26 : vector<8x640xf32>
    %124 = vector.extract_strided_slice %123 {offsets = [0, 0], sizes = [8, 128], strides = [1, 1]} : vector<8x640xf32> to vector<8x128xf32>
    %cst_41 = arith.constant dense<0.000000e+00> : vector<12x128xf32>
    %125 = tpu.matmul %10, %124, %cst_41 {dimension_numbers = #tpu.dot_dimension_numbers<[1], [0], [0], [1], [0, 0, 1, 1], [], []>} : vector<12x8xf32>, vector<8x128xf32>, vector<12x128xf32> -> vector<12x128xf32>
    %126 = vector.extract_strided_slice %123 {offsets = [0, 128], sizes = [8, 128], strides = [1, 1]} : vector<8x640xf32> to vector<8x128xf32>
    %cst_42 = arith.constant dense<0.000000e+00> : vector<12x128xf32>
    %127 = tpu.matmul %14, %126, %cst_42 {dimension_numbers = #tpu.dot_dimension_numbers<[1], [0], [0], [1], [0, 0, 1, 1], [], []>} : vector<12x8xf32>, vector<8x128xf32>, vector<12x128xf32> -> vector<12x128xf32>
    %128 = arith.addf %125, %127 : vector<12x128xf32>
    %cst_43 = arith.constant 0.000000e+00 : f32
    %129 = vector.broadcast %cst_43 : f32 to vector<12x128xf32>
    %130 = arith.cmpf ogt, %128, %129 : vector<12x128xf32>
    %131 = math.exp %128 : vector<12x128xf32>
    %cst_44 = arith.constant 1.000000e+00 : f32
    %132 = vector.broadcast %cst_44 : f32 to vector<12x128xf32>
    %133 = arith.subf %131, %132 : vector<12x128xf32>
    %cst_45 = arith.constant 1.67326319 : f32
    %134 = vector.broadcast %cst_45 : f32 to vector<12x128xf32>
    %135 = arith.mulf %134, %133 : vector<12x128xf32>
    %136 = arith.select %130, %128, %135 : vector<12x128xi1>, vector<12x128xf32>
    %cst_46 = arith.constant 1.05070102 : f32
    %137 = vector.broadcast %cst_46 : f32 to vector<12x128xf32>
    %138 = arith.mulf %137, %136 : vector<12x128xf32>
    %cst_47 = arith.constant dense<0.000000e+00> : vector<8x128xf32>
    %139 = tpu.matmul %21, %138, %cst_47 {dimension_numbers = #tpu.dot_dimension_numbers<[1], [0], [0], [1], [0, 0, 1, 1], [], []>} : vector<8x12xf32>, vector<12x128xf32>, vector<8x128xf32> -> vector<8x128xf32>
    %cst_48 = arith.constant dense<0.000000e+00> : vector<8x384xf32>
    %140 = tpu.matmul %139, %23, %cst_48 {dimension_numbers = #tpu.dot_dimension_numbers<[1], [0], [0], [1], [0, 0, 1, 1], [], []>} : vector<8x128xf32>, vector<128x384xf32>, vector<8x384xf32> -> vector<8x384xf32>
    %141 = arith.addf %140, %29 : vector<8x384xf32>
    %142 = vector.extract_strided_slice %141 {offsets = [0, 0], sizes = [8, 128], strides = [1, 1]} : vector<8x384xf32> to vector<8x128xf32>
    %143 = vector.extract_strided_slice %123 {offsets = [0, 256], sizes = [8, 128], strides = [1, 1]} : vector<8x640xf32> to vector<8x128xf32>
    %144 = arith.addf %142, %143 : vector<8x128xf32>
    %145 = arith.negf %144 : vector<8x128xf32>
    %146 = math.exp %145 : vector<8x128xf32>
    %cst_49 = arith.constant 1.000000e+00 : f32
    %147 = vector.broadcast %cst_49 : f32 to vector<8x128xf32>
    %148 = arith.addf %147, %146 : vector<8x128xf32>
    %149 = arith.divf %147, %148 : vector<8x128xf32>
    %150 = vector.extract_strided_slice %141 {offsets = [0, 128], sizes = [8, 128], strides = [1, 1]} : vector<8x384xf32> to vector<8x128xf32>
    %151 = vector.extract_strided_slice %123 {offsets = [0, 384], sizes = [8, 128], strides = [1, 1]} : vector<8x640xf32> to vector<8x128xf32>
    %152 = arith.addf %150, %151 : vector<8x128xf32>
    %153 = arith.negf %152 : vector<8x128xf32>
    %154 = math.exp %153 : vector<8x128xf32>
    %cst_50 = arith.constant 1.000000e+00 : f32
    %155 = vector.broadcast %cst_50 : f32 to vector<8x128xf32>
    %156 = arith.addf %155, %154 : vector<8x128xf32>
    %157 = arith.divf %155, %156 : vector<8x128xf32>
    %158 = vector.extract_strided_slice %141 {offsets = [0, 256], sizes = [8, 128], strides = [1, 1]} : vector<8x384xf32> to vector<8x128xf32>
    %159 = vector.extract_strided_slice %123 {offsets = [0, 512], sizes = [8, 128], strides = [1, 1]} : vector<8x640xf32> to vector<8x128xf32>
    %160 = arith.mulf %149, %159 : vector<8x128xf32>
    %161 = arith.addf %158, %160 : vector<8x128xf32>
    %162 = math.tanh %161 : vector<8x128xf32>
    %cst_51 = arith.constant 1.000000e+00 : f32
    %163 = vector.broadcast %cst_51 : f32 to vector<8x128xf32>
    %164 = arith.subf %163, %157 : vector<8x128xf32>
    %165 = arith.mulf %164, %162 : vector<8x128xf32>
    %166 = arith.mulf %157, %121 : vector<8x128xf32>
    %167 = arith.addf %165, %166 : vector<8x128xf32>
    %cst_52 = arith.constant dense<0.000000e+00> : vector<8x640xf32>
    %168 = tpu.matmul %167, %22, %cst_52 {dimension_numbers = #tpu.dot_dimension_numbers<[1], [0], [0], [1], [0, 0, 1, 1], [], []>} : vector<8x128xf32>, vector<128x640xf32>, vector<8x640xf32> -> vector<8x640xf32>
    %169 = arith.addf %168, %26 : vector<8x640xf32>
    %170 = vector.extract_strided_slice %169 {offsets = [0, 0], sizes = [8, 128], strides = [1, 1]} : vector<8x640xf32> to vector<8x128xf32>
    %cst_53 = arith.constant dense<0.000000e+00> : vector<12x128xf32>
    %171 = tpu.matmul %10, %170, %cst_53 {dimension_numbers = #tpu.dot_dimension_numbers<[1], [0], [0], [1], [0, 0, 1, 1], [], []>} : vector<12x8xf32>, vector<8x128xf32>, vector<12x128xf32> -> vector<12x128xf32>
    %172 = vector.extract_strided_slice %169 {offsets = [0, 128], sizes = [8, 128], strides = [1, 1]} : vector<8x640xf32> to vector<8x128xf32>
    %cst_54 = arith.constant dense<0.000000e+00> : vector<12x128xf32>
    %173 = tpu.matmul %14, %172, %cst_54 {dimension_numbers = #tpu.dot_dimension_numbers<[1], [0], [0], [1], [0, 0, 1, 1], [], []>} : vector<12x8xf32>, vector<8x128xf32>, vector<12x128xf32> -> vector<12x128xf32>
    %174 = arith.addf %171, %173 : vector<12x128xf32>
    %cst_55 = arith.constant 0.000000e+00 : f32
    %175 = vector.broadcast %cst_55 : f32 to vector<12x128xf32>
    %176 = arith.cmpf ogt, %174, %175 : vector<12x128xf32>
    %177 = math.exp %174 : vector<12x128xf32>
    %cst_56 = arith.constant 1.000000e+00 : f32
    %178 = vector.broadcast %cst_56 : f32 to vector<12x128xf32>
    %179 = arith.subf %177, %178 : vector<12x128xf32>
    %cst_57 = arith.constant 1.67326319 : f32
    %180 = vector.broadcast %cst_57 : f32 to vector<12x128xf32>
    %181 = arith.mulf %180, %179 : vector<12x128xf32>
    %182 = arith.select %176, %174, %181 : vector<12x128xi1>, vector<12x128xf32>
    %cst_58 = arith.constant 1.05070102 : f32
    %183 = vector.broadcast %cst_58 : f32 to vector<12x128xf32>
    %184 = arith.mulf %183, %182 : vector<12x128xf32>
    %cst_59 = arith.constant dense<0.000000e+00> : vector<8x128xf32>
    %185 = tpu.matmul %21, %184, %cst_59 {dimension_numbers = #tpu.dot_dimension_numbers<[1], [0], [0], [1], [0, 0, 1, 1], [], []>} : vector<8x12xf32>, vector<12x128xf32>, vector<8x128xf32> -> vector<8x128xf32>
    %cst_60 = arith.constant dense<0.000000e+00> : vector<8x384xf32>
    %186 = tpu.matmul %185, %23, %cst_60 {dimension_numbers = #tpu.dot_dimension_numbers<[1], [0], [0], [1], [0, 0, 1, 1], [], []>} : vector<8x128xf32>, vector<128x384xf32>, vector<8x384xf32> -> vector<8x384xf32>
    %187 = arith.addf %186, %29 : vector<8x384xf32>
    %188 = vector.extract_strided_slice %187 {offsets = [0, 0], sizes = [8, 128], strides = [1, 1]} : vector<8x384xf32> to vector<8x128xf32>
    %189 = vector.extract_strided_slice %169 {offsets = [0, 256], sizes = [8, 128], strides = [1, 1]} : vector<8x640xf32> to vector<8x128xf32>
    %190 = arith.addf %188, %189 : vector<8x128xf32>
    %191 = arith.negf %190 : vector<8x128xf32>
    %192 = math.exp %191 : vector<8x128xf32>
    %cst_61 = arith.constant 1.000000e+00 : f32
    %193 = vector.broadcast %cst_61 : f32 to vector<8x128xf32>
    %194 = arith.addf %193, %192 : vector<8x128xf32>
    %195 = arith.divf %193, %194 : vector<8x128xf32>
    %196 = vector.extract_strided_slice %187 {offsets = [0, 128], sizes = [8, 128], strides = [1, 1]} : vector<8x384xf32> to vector<8x128xf32>
    %197 = vector.extract_strided_slice %169 {offsets = [0, 384], sizes = [8, 128], strides = [1, 1]} : vector<8x640xf32> to vector<8x128xf32>
    %198 = arith.addf %196, %197 : vector<8x128xf32>
    %199 = arith.negf %198 : vector<8x128xf32>
    %200 = math.exp %199 : vector<8x128xf32>
    %cst_62 = arith.constant 1.000000e+00 : f32
    %201 = vector.broadcast %cst_62 : f32 to vector<8x128xf32>
    %202 = arith.addf %201, %200 : vector<8x128xf32>
    %203 = arith.divf %201, %202 : vector<8x128xf32>
    %204 = vector.extract_strided_slice %187 {offsets = [0, 256], sizes = [8, 128], strides = [1, 1]} : vector<8x384xf32> to vector<8x128xf32>
    %205 = vector.extract_strided_slice %169 {offsets = [0, 512], sizes = [8, 128], strides = [1, 1]} : vector<8x640xf32> to vector<8x128xf32>
    %206 = arith.mulf %195, %205 : vector<8x128xf32>
    %207 = arith.addf %204, %206 : vector<8x128xf32>
    %208 = math.tanh %207 : vector<8x128xf32>
    %cst_63 = arith.constant 1.000000e+00 : f32
    %209 = vector.broadcast %cst_63 : f32 to vector<8x128xf32>
    %210 = arith.subf %209, %203 : vector<8x128xf32>
    %211 = arith.mulf %210, %208 : vector<8x128xf32>
    %212 = arith.mulf %203, %167 : vector<8x128xf32>
    %213 = arith.addf %211, %212 : vector<8x128xf32>
    %c0_64 = arith.constant 0 : index
    %c0_65 = arith.constant 0 : index
    %214 = vector.load %arg6[%c0_64, %c0_65] : memref<128x128xf32, #tpu.memory_space<vmem>>, vector<128x128xf32>
    %cst_66 = arith.constant dense<0.000000e+00> : vector<8x128xf32>
    %215 = tpu.matmul %213, %214, %cst_66 {dimension_numbers = #tpu.dot_dimension_numbers<[1], [0], [0], [1], [0, 0, 1, 1], [], []>} : vector<8x128xf32>, vector<128x128xf32>, vector<8x128xf32> -> vector<8x128xf32>
    %cst_67 = arith.constant dense<0.000000e+00> : vector<128xf32>
    %216 = vector.multi_reduction <add>, %215, %cst_67 [0] : vector<8x128xf32> to vector<128xf32>
    %217 = vector.shape_cast %216 : vector<128xf32> to vector<1x128xf32>
    %c0_68 = arith.constant 0 : index
    %c0_69 = arith.constant 0 : index
    %218 = vector.load %arg8[%c0_68, %c0_69] : memref<1x512xf32, #tpu.memory_space<vmem>>, vector<1x128xf32>
    %219 = arith.addf %217, %218 : vector<1x128xf32>
    %cst_70 = arith.constant 0.000000e+00 : f32
    %220 = vector.broadcast %cst_70 : f32 to vector<1x128xf32>
    %221 = arith.cmpf ogt, %219, %220 : vector<1x128xf32>
    %222 = math.exp %219 : vector<1x128xf32>
    %cst_71 = arith.constant 1.000000e+00 : f32
    %223 = vector.broadcast %cst_71 : f32 to vector<1x128xf32>
    %224 = arith.subf %222, %223 : vector<1x128xf32>
    %cst_72 = arith.constant 1.67326319 : f32
    %225 = vector.broadcast %cst_72 : f32 to vector<1x128xf32>
    %226 = arith.mulf %225, %224 : vector<1x128xf32>
    %227 = arith.select %221, %219, %226 : vector<1x128xi1>, vector<1x128xf32>
    %cst_73 = arith.constant 1.05070102 : f32
    %228 = vector.broadcast %cst_73 : f32 to vector<1x128xf32>
    %229 = arith.mulf %228, %227 : vector<1x128xf32>
    %c0_74 = arith.constant 0 : index
    %c0_75 = arith.constant 0 : index
    %230 = vector.load %arg7[%c0_74, %c0_75] : memref<128x128xf32, #tpu.memory_space<vmem>>, vector<128x128xf32>
    %cst_76 = arith.constant dense<0.000000e+00> : vector<1x128xf32>
    %231 = tpu.matmul %229, %230, %cst_76 {dimension_numbers = #tpu.dot_dimension_numbers<[1], [0], [0], [1], [0, 0, 1, 1], [], []>} : vector<1x128xf32>, vector<128x128xf32>, vector<1x128xf32> -> vector<1x128xf32>
    %c0_77 = arith.constant 0 : index
    %c128 = arith.constant 128 : index
    %232 = vector.load %arg8[%c0_77, %c128] : memref<1x512xf32, #tpu.memory_space<vmem>>, vector<1x128xf32>
    %233 = arith.addf %231, %232 : vector<1x128xf32>
    %cst_78 = arith.constant 0.000000e+00 : f32
    %234 = vector.broadcast %cst_78 : f32 to vector<1x128xf32>
    %235 = arith.cmpf ogt, %233, %234 : vector<1x128xf32>
    %236 = math.exp %233 : vector<1x128xf32>
    %cst_79 = arith.constant 1.000000e+00 : f32
    %237 = vector.broadcast %cst_79 : f32 to vector<1x128xf32>
    %238 = arith.subf %236, %237 : vector<1x128xf32>
    %cst_80 = arith.constant 1.67326319 : f32
    %239 = vector.broadcast %cst_80 : f32 to vector<1x128xf32>
    %240 = arith.mulf %239, %238 : vector<1x128xf32>
    %241 = arith.select %235, %233, %240 : vector<1x128xi1>, vector<1x128xf32>
    %cst_81 = arith.constant 1.05070102 : f32
    %242 = vector.broadcast %cst_81 : f32 to vector<1x128xf32>
    %243 = arith.mulf %242, %241 : vector<1x128xf32>
    %c0_82 = arith.constant 0 : index
    %c256 = arith.constant 256 : index
    %244 = vector.load %arg8[%c0_82, %c256] : memref<1x512xf32, #tpu.memory_space<vmem>>, vector<1x128xf32>
    %c0_83 = arith.constant 0 : index
    %c384 = arith.constant 384 : index
    %245 = vector.load %arg8[%c0_83, %c384] : memref<1x512xf32, #tpu.memory_space<vmem>>, vector<1x1xf32>
    %246 = arith.mulf %243, %244 : vector<1x128xf32>
    %cst_84 = arith.constant dense<0.000000e+00> : vector<1xf32>
    %247 = vector.multi_reduction <add>, %246, %cst_84 [1] : vector<1x128xf32> to vector<1xf32>
    %248 = vector.shape_cast %247 : vector<1xf32> to vector<1x1xf32>
    %249 = arith.addf %248, %245 : vector<1x1xf32>
    %250 = vector.shape_cast %249 : vector<1x1xf32> to vector<1x1xf32>
    %251 = vector.broadcast %250 : vector<1x1xf32> to vector<1x128xf32>
    %c0_85 = arith.constant 0 : index
    %c0_86 = arith.constant 0 : index
    %c0_87 = arith.constant 0 : index
    %252 = vector.load %arg9[%c0_85, %c0_86, %c0_87] : memref<1x1x128xf32, #tpu.memory_space<vmem>>, vector<1x1x128xf32>
    %253 = vector.shape_cast %252 : vector<1x1x128xf32> to vector<1x128xf32>
    %254 = vector.shape_cast %251 : vector<1x128xf32> to vector<1x1x128xf32>
    tpu.vector_store %arg9[%c0_85, %c0_86, %c0_87], %254 {strides = array<i32>} : memref<1x1x128xf32, #tpu.memory_space<vmem>>, vector<1x1x128xf32>,
    return
  }
  func.func @transform_0(%arg0: i32) -> (i32, i32, i32) {
    %c0_i32 = arith.constant 0 : i32
    %c0_i32_0 = arith.constant 0 : i32
    %c0_i32_1 = arith.constant 0 : i32
    return %arg0, %c0_i32, %c0_i32_0 : i32, i32, i32
  }
  func.func @transform_1(%arg0: i32) -> (i32, i32, i32) {
    %c0_i32 = arith.constant 0 : i32
    %c0_i32_0 = arith.constant 0 : i32
    %c0_i32_1 = arith.constant 0 : i32
    return %arg0, %c0_i32, %c0_i32_0 : i32, i32, i32
  }
  func.func @transform_2(%arg0: i32) -> (i32, i32, i32) {
    %c0_i32 = arith.constant 0 : i32
    %c0_i32_0 = arith.constant 0 : i32
    %c0_i32_1 = arith.constant 0 : i32
    return %arg0, %c0_i32, %c0_i32_0 : i32, i32, i32
  }
  func.func @transform_3(%arg0: i32) -> (i32, i32) {
    %c0_i32 = arith.constant 0 : i32
    %c0_i32_0 = arith.constant 0 : i32
    %c0_i32_1 = arith.constant 0 : i32
    return %c0_i32, %c0_i32_0 : i32, i32
  }
  func.func @transform_4(%arg0: i32) -> (i32, i32) {
    %c0_i32 = arith.constant 0 : i32
    %c0_i32_0 = arith.constant 0 : i32
    %c0_i32_1 = arith.constant 0 : i32
    return %c0_i32, %c0_i32_0 : i32, i32
  }
  func.func @transform_5(%arg0: i32) -> (i32, i32) {
    %c0_i32 = arith.constant 0 : i32
    %c0_i32_0 = arith.constant 0 : i32
    %c0_i32_1 = arith.constant 0 : i32
    return %c0_i32, %c0_i32_0 : i32, i32
  }
  func.func @transform_6(%arg0: i32) -> (i32, i32) {
    %c0_i32 = arith.constant 0 : i32
    %c0_i32_0 = arith.constant 0 : i32
    %c0_i32_1 = arith.constant 0 : i32
    return %c0_i32, %c0_i32_0 : i32, i32
  }
  func.func @transform_7(%arg0: i32) -> (i32, i32) {
    %c0_i32 = arith.constant 0 : i32
    %c0_i32_0 = arith.constant 0 : i32
    %c0_i32_1 = arith.constant 0 : i32
    return %c0_i32, %c0_i32_0 : i32, i32
  }
  func.func @transform_8(%arg0: i32) -> (i32, i32, i32) {
    %c0_i32 = arith.constant 0 : i32
    %c0_i32_0 = arith.constant 0 : i32
    %c0_i32_1 = arith.constant 0 : i32
    return %arg0, %c0_i32, %c0_i32_0 : i32, i32, i32
  }
}

</mosaic_0001>

<bundles_post_ra>
// kernel: critic_forward.1
= control target key start
LH: loop header
LB: loop body
LE: loop exit
PB: predicated region body
PF: predicated region fallthrough
CT: control target
= control target key end

     0   :  { %s2176_s27 = smov 0   ;;  %s4056_s0 = inlined_call_operand.vmem [shape: s32[4,12,2], index: 0, kind: input, shape index: {}]   ;;  %s4057_s1 = inlined_call_operand.vmem [shape: s32[4,1,12], index: 1, kind: input, shape index: {}]   ;;  %s4058_s2 = inlined_call_operand.vmem [shape: f32[4,8,128], index: 2, kind: input, shape index: {}]   ;;  %s4059_s3 = inlined_call_operand.vmem [shape: f32[128,1024], index: 3, kind: input, shape index: {}]   ;;  %s4060_s4 = inlined_call_operand.vmem [shape: f32[1,1024], index: 4, kind: input, shape index: {}]   ;;  %s4061_s5 = inlined_call_operand.vmem [shape: f32[128,128], index: 5, kind: input, shape index: {}]   ;;  %s4062_s6 = inlined_call_operand.vmem [shape: f32[128,128], index: 6, kind: input, shape index: {}]   ;;  %s4063_s7 = inlined_call_operand.vmem [shape: f32[1,512], index: 7, kind: input, shape index: {}]   ;;  %s4064_s8 = inlined_call_operand.vmem [shape: f32[4,1,128], index: 8, kind: output, shape index: {}]  }
   0x1 LB: > { %s1872_s28 = sadd.s32 4294967295, %s2126_s27   ;;  %p1876_p0 = scmp.ge.s32.totalorder %s2126_s27, 1  ;;  %s2126_s27 = sphi %s2176_s27, %s18_s27  }
   0x2   : > { %p279_p1 = scmp.lt.s32.totalorder %s2126_s27, 5 }
   0x4   : > { %p280_p2 = pnand %p1876_p0, %p279_p1 }
   0x6   : > { %283 = sbr.rel (%p280_p2) target bundleno = 2942 (0xb7e), region = 52 }
   0xb   : > { %v2187_v0 = vld [vmem:[%s4059_s3 + $0x3c0] sm:$0xff]  ;;  %p318_p3 = scmp.lt.s32.totalorder %s1872_s28, 3  ;;  %v2198_v2 = vld [vmem:[%s4059_s3 + $0x3c8] sm:$0xff]  ;;  %v2128_v5 = vmov 0   ;;  %v2277_v17 = vld [vmem:[%s4059_s3 + $0x3d0] sm:$0xff]  ;;  %v2129_v29 = vmov 1   ;;  %v4065_v55 = vlaneseq }
   0xc   : > { %v2192_v1 = vld [vmem:[%s4059_s3 + $0x380] sm:$0xff]  ;;  %517 = vmatpush.msra.mxu0 %v2187_v0  ;;  %537 = vmatpush.msra.mxu1 %v2198_v2  ;;  %v2209_v4 = vld [vmem:[%s4059_s3 + $0x388] sm:$0xff]  ;;  %v2294_v20 = vld [vmem:[%s4059_s3 + $0x390] sm:$0xff]  ;;  %vm617_vm2 = vcmask 64512   ;;  %vm694_vm7 = vcmask 1043456   ;;  %vm690_vm9 = vcmask 97280  }
   0xd   : > { %4217 = vst [vmem:[#allocation2_spill] sm:$0xff] %v2192_v1  ;;  %v2203_v3 = vld [vmem:[%s4059_s3 + $0x340] sm:$0xff]  ;;  %1941 = vset.pattern.permute.xlu0 %v2128_v5  ;;  %v2216_v6 = vld [vmem:[%s4059_s3 + $0x348] sm:$0xff]  ;;  %s4467_s28 = smov (!%p318_p3, %s1872_s28), 3  ;;  %1943 = vset.pattern.permute.xlu1 %v2128_v5  ;;  %v2312_v23 = vld [vmem:[%s4059_s3 + $0x350] sm:$0xff]  ;;  %v337_v61 = vand.u32 127, %v4065_v55 }
   0xe   : > { %4218 = vst [vmem:[#allocation3_spill] sm:$0xff] %v2203_v3  ;;  %518 = vmatpush.msra.mxu0 %v2192_v1  ;;  %v2224_v7 = vld [vmem:[%s4059_s3 + $0x300] sm:$0xff]  ;;  %538 = vmatpush.msra.mxu1 %v2209_v4  ;;  %v2232_v8 = vld [vmem:[%s4059_s3 + $0x308] sm:$0xff]  ;;  %s1929_s23 = sshll.u32 %s4467_s28, 4  ;;  %v2355_v31 = vld [vmem:[%s4059_s3 + $0x310] sm:$0xff]  ;;  %s1879_s11 = sshll.u32 %s4467_s28, 3 }
   0xf   : > { %4219 = vst [vmem:[#allocation4_spill] sm:$0xff] %v2224_v7  ;;  %1945 = vset.pattern.permute.xlu2 %v2128_v5  ;;  %v2238_v9 = vld [vmem:[%s4059_s3 + $0x2c0] sm:$0xff]  ;;  %v2245_v10 = vld [vmem:[%s4059_s3 + $0x2c8] sm:$0xff]  ;;  %s322_s12 = scalar_lea.vmem %s4056_s0, %s1929_s23  ;;  %557 = vmatpush.msra.mxu2 %v2277_v17  ;;  %v2373_v34 = vld [vmem:[%s4059_s3 + $0x2d0] sm:$0xff]  ;;  %s329_s24 = scalar_lea.vmem %s4058_s2, %s1879_s11 }
  0x10   : > { %519 = vmatpush.msra.mxu0 %v2203_v3  ;;  %4220 = vst [vmem:[#allocation5_spill] sm:$0xff] %v2238_v9  ;;  %539 = vmatpush.msra.mxu1 %v2216_v6  ;;  %v2250_v11 = vld [vmem:[%s4059_s3 + $0x280] sm:$0xff]  ;;  %v2260_v12 = vld [vmem:[%s4059_s3 + $0x288] sm:$0xff]  ;;  %v2391_v37 = vld [vmem:[%s4059_s3 + $0x290] sm:$0xff]  ;;  %s325_s25 = scalar_lea.vmem %s4057_s1, %s4467_s28  ;;  %s332_s20 = scalar_lea.vmem %s4064_s8, %s4467_s28 }
  0x11   : > { %4221 = vst [vmem:[#allocation6_spill] sm:$0xff] %v2250_v11  ;;  %v2265_v13 = vld [vmem:[%s4059_s3 + $0x240] sm:$0xff]  ;;  %v2271_v14 = vld [vmem:[%s4059_s3 + $0x248] sm:$0xff]  ;;  %558 = vmatpush.msra.mxu2 %v2294_v20  ;;  %v2412_v40 = vld [vmem:[%s4059_s3 + $0x250] sm:$0xff] }
  0x12   : > { %520 = vmatpush.msra.mxu0 %v2224_v7  ;;  %540 = vmatpush.msra.mxu1 %v2232_v8  ;;  %4222 = vst [vmem:[#allocation7_spill] sm:$0xff] %v2265_v13  ;;  %v334_v15 = vld [vmem:[%s322_s12] sm:$0xff]  ;;  %v335_v16 = vld [vmem:[%s322_s12 + $0x8] sm:$0xf]  ;;  %v2435_v44 = vld [vmem:[%s4059_s3 + $0x210] sm:$0xff] }
  0x13   : > { %v2282_v18 = vld [vmem:[%s4059_s3 + $0x200] sm:$0xff]  ;;  %339 = vperm.xlu0 %1941, %v334_v15   ;;  %v2289_v19 = vld [vmem:[%s4059_s3 + $0x208] sm:$0xff]  ;;  %342 = vperm.xlu1 %1943, %v335_v16   ;;  %4229 = vst [vmem:[#allocation14_spill] sm:$0xff] %v2373_v34  ;;  %v2443_v45 = vld [vmem:[%s4059_s3 + $0x1d0] sm:$0xff] }
  0x14   : > { %521 = vmatpush.msra.mxu0 %v2238_v9  ;;  %541 = vmatpush.msra.mxu1 %v2245_v10  ;;  %4223 = vst [vmem:[#allocation8_spill] sm:$0xff] %v2282_v18  ;;  %v2299_v21 = vld [vmem:[%s4059_s3 + $0x1c0] sm:$0xff]  ;;  %v2307_v22 = vld [vmem:[%s4059_s3 + $0x1c8] sm:$0xff]  ;;  %v2450_v46 = vld [vmem:[%s4059_s3 + $0x190] sm:$0xff] }
  0x15   : > { %4224 = vst [vmem:[#allocation9_spill] sm:$0xff] %v2299_v21  ;;  %v2317_v24 = vld [vmem:[%s4059_s3 + $0x180] sm:$0xff]  ;;  %v2325_v25 = vld [vmem:[%s4059_s3 + $0x188] sm:$0xff]  ;;  %559 = vmatpush.msra.mxu2 %v2312_v23  ;;  %v2456_v47 = vld [vmem:[%s4059_s3 + $0x150] sm:$0xff] }
  0x16   : > { %522 = vmatpush.msra.mxu0 %v2250_v11  ;;  %542 = vmatpush.msra.mxu1 %v2260_v12  ;;  %4225 = vst [vmem:[#allocation10_spill] sm:$0xff] %v2317_v24  ;;  %v2330_v26 = vld [vmem:[%s4059_s3 + $0x140] sm:$0xff]  ;;  %v2338_v27 = vld [vmem:[%s4059_s3 + $0x148] sm:$0xff]  ;;  %v2462_v48 = vld [vmem:[%s4059_s3 + $0x110] sm:$0xff] }
  0x17   : > { %4226 = vst [vmem:[#allocation11_spill] sm:$0xff] %v2330_v26  ;;  %v2343_v28 = vld [vmem:[%s4059_s3 + $0x100] sm:$0xff]  ;;  %v2350_v30 = vld [vmem:[%s4059_s3 + $0x108] sm:$0xff]  ;;  %560 = vmatpush.msra.mxu2 %v2355_v31  ;;  %v2468_v49 = vld [vmem:[%s4059_s3 + $0xd0] sm:$0xff] }
  0x18   : > { %523 = vmatpush.msra.mxu0 %v2265_v13  ;;  %543 = vmatpush.msra.mxu1 %v2271_v14  ;;  %4227 = vst [vmem:[#allocation12_spill] sm:$0xff] %v2343_v28  ;;  %v2360_v32 = vld [vmem:[%s4059_s3 + $0xc0] sm:$0xff]  ;;  %v2367_v33 = vld [vmem:[%s4059_s3 + $0xc8] sm:$0xff]  ;;  %v2474_v50 = vld [vmem:[%s4059_s3 + $0x90] sm:$0xff] }
  0x19   : > { %4228 = vst [vmem:[#allocation13_spill] sm:$0xff] %v2360_v32  ;;  %v2378_v35 = vld [vmem:[%s4059_s3 + $0x80] sm:$0xff]  ;;  %v2386_v36 = vld [vmem:[%s4059_s3 + $0x88] sm:$0xff]  ;;  %561 = vmatpush.msra.mxu2 %v2373_v34  ;;  %v2480_v51 = vld [vmem:[%s4059_s3 + $0x50] sm:$0xff] }
  0x1a   : > { %524 = vmatpush.msra.mxu0 %v2282_v18  ;;  %544 = vmatpush.msra.mxu1 %v2289_v19  ;;  %4230 = vst [vmem:[#allocation15_spill] sm:$0xff] %v2378_v35  ;;  %v2396_v38 = vld [vmem:[%s4059_s3 + $0x40] sm:$0xff]  ;;  %v2407_v39 = vld [vmem:[%s4059_s3 + $0x48] sm:$0xff]  ;;  %v2486_v52 = vld [vmem:[%s4059_s3 + $0x10] sm:$0xff] }
  0x1b   : > { %1942 = vset.pattern.permute.xlu0 %v2129_v29  ;;  %1944 = vset.pattern.permute.xlu1 %v2129_v29  ;;  %4231 = vst [vmem:[#allocation16_spill] sm:$0xff] %v2391_v37  ;;  %v2417_v41 = vld [vmem:[%s4059_s3] sm:$0xff]  ;;  %v2427_v43 = vld [vmem:[%s4059_s3 + $0x8] sm:$0xff]  ;;  %v2494_v53 = vld [vmem:[%s4059_s3 + $0x3d8] sm:$0xff] }
  0x1c   : > { %525 = vmatpush.msra.mxu0 %v2299_v21  ;;  %545 = vmatpush.msra.mxu1 %v2307_v22  ;;  %4232 = vst [vmem:[#allocation17_spill] sm:$0xff] %v2396_v38  ;;  %v2422_v42 = vld [vmem:[%s329_s24] sm:$0xff]  ;;  %v2500_v56 = vld [vmem:[%s4059_s3 + $0x398] sm:$0xff] }
  0x1d   : > { %351 = vperm.xlu0 %1942, %v334_v15   ;;  %354 = vperm.xlu1 %1944, %v335_v16   ;;  %4233 = vst [vmem:[#allocation18_spill] sm:$0xff] %v2412_v40  ;;  %v2505_v57 = vld [vmem:[%s4059_s3 + $0x358] sm:$0xff]  ;;  %v2510_v58 = vld [vmem:[%s4060_s4] sm:$0x1f] }
  0x1e   : > { %526 = vmatpush.msra.mxu0 %v2317_v24  ;;  %546 = vmatpush.msra.mxu1 %v2325_v25  ;;  %4234 = vst [vmem:[#allocation19_spill] sm:$0xff] %v2417_v41  ;;  %v2516_v60 = vld [vmem:[%s4059_s3 + $0x318] sm:$0xff]  ;;  %v2521_v63 = vperm.slane %v2510_v58, 0  ;;  %v2529_v15 = vperm.slane %v2510_v58, 1 }
  0x1f   : > { %562 = vmatpush.msra.mxu2 %v2391_v37  ;;  %4235 = vst [vmem:[#allocation20_spill] sm:$0xff] %v2427_v43  ;;  %577 = vmatpush.msra.mxu3 %v2494_v53 }
  0x20   : > { %527 = vmatpush.msra.mxu0 %v2330_v26  ;;  %547 = vmatpush.msra.mxu1 %v2338_v27  ;;  %4236 = vst [vmem:[#allocation21_spill] sm:$0xff] %v2435_v44  ;;  %v2648_v26 = vld [vmem:[%s4059_s3 + $0x3b0] sm:$0xff] }
  0x21   : > { %563 = vmatpush.msra.mxu2 %v2412_v40  ;;  %4237 = vst [vmem:[#allocation22_spill] sm:$0xff] %v2443_v45  ;;  %578 = vmatpush.msra.mxu3 %v2500_v56 }
  0x22   : > { %528 = vmatpush.msra.mxu0 %v2343_v28  ;;  %548 = vmatpush.msra.mxu1 %v2350_v30  ;;  %4238 = vst [vmem:[#allocation23_spill] sm:$0xff] %v2450_v46  ;;  %v2636_v28 = vld [vmem:[%s4059_s3 + $0x3f0] sm:$0xff] }
  0x23   : > { %564 = vmatpush.msra.mxu2 %v2435_v44  ;;  %4239 = vst [vmem:[#allocation24_spill] sm:$0xff] %v2456_v47  ;;  %579 = vmatpush.msra.mxu3 %v2505_v57 }
  0x24   : > { %529 = vmatpush.msra.mxu0 %v2360_v32  ;;  %549 = vmatpush.msra.mxu1 %v2367_v33  ;;  %4240 = vst [vmem:[#allocation25_spill] sm:$0xff] %v2462_v48  ;;  %v2631_v32 = vld [vmem:[%s4059_s3 + $0x3e8] sm:$0xff] }
  0x25   : > { %1946 = vset.pattern.permute.xlu0 %v2128_v5  ;;  %565 = vmatpush.msra.mxu2 %v2443_v45  ;;  %4241 = vst [vmem:[#allocation26_spill] sm:$0xff] %v2468_v49  ;;  %v2526_v5 = vld [vmem:[%s4059_s3 + $0x2d8] sm:$0xff] }
  0x26   : > { %530 = vmatpush.msra.mxu0 %v2378_v35  ;;  %550 = vmatpush.msra.mxu1 %v2386_v36  ;;  %4242 = vst [vmem:[#allocation27_spill] sm:$0xff] %v2474_v50 }
  0x27   : > { %566 = vmatpush.msra.mxu2 %v2450_v46  ;;  %4243 = vst [vmem:[#allocation28_spill] sm:$0xff] %v2480_v51  ;;  %580 = vmatpush.msra.mxu3 %v2516_v60 }
  0x28   : > { %531 = vmatpush.msra.mxu0 %v2396_v38  ;;  %551 = vmatpush.msra.mxu1 %v2407_v39  ;;  %4244 = vst [vmem:[#allocation29_spill] sm:$0xff] %v2486_v52  ;;  %v4074_v38 = vmov 0.0  }
  0x29   : > { %567 = vmatpush.msra.mxu2 %v2456_v47  ;;  %4245 = vst [vmem:[#allocation30_spill] sm:$0xff] %v2510_v58  ;;  %581 = vmatpush.msra.mxu3 %v2526_v5 }
  0x2a   : > { %532 = vmatpush.msra.mxu0 %v2417_v41  ;;  %552 = vmatpush.msra.mxu1 %v2427_v43  ;;  %4246 = vst [vmem:[#allocation31_spill] sm:$0xff] %v2521_v63 }
  0x2b   : > { %533 = vmatmul.f32.vlgmr.msra.gmra.mxu0 %v2422_v42  ;;  %553 = vmatmul.f32.vlgmr.msra.gmra.mxu1 %v2422_v42  ;;  %4247 = vst [vmem:[#allocation32_spill] sm:$0xff] %v2529_v15 }
  0x2c   : > { %568 = vmatpush.msra.mxu2 %v2462_v48  ;;  %4264 = vst [vmem:[#allocation49_spill] sm:$0xff] %v2631_v32 }
  0x2d   : > { %4265 = vst [vmem:[#allocation50_spill] sm:$0xff] %v2636_v28 }
  0x2e   : > { %569 = vmatpush.msra.mxu2 %v2468_v49  ;;  %4267 = vst [vmem:[#allocation52_spill] sm:$0xff] %v2648_v26 }
  0x30   : > { %570 = vmatpush.msra.mxu2 %v2474_v50 }
  0x32   : > { %571 = vmatpush.msra.mxu2 %v2480_v51 }
  0x34   : > { %572 = vmatpush.msra.mxu2 %v2486_v52 }
  0x35   : > { %573 = vmatmul.f32.vlgmr.msra.gmra.mxu2 %v2422_v42 }
  0x85   : > { %v340_v54 = vpop.permute.xlu0 %339  ;;  %v343_v59 = vpop.permute.xlu1 %342 }
  0x86   : > { %vm344_vm1 = vcmp.eq.s32.totalorder %v337_v61, %v340_v54  ;;  %vm345_vm4 = vcmp.eq.s32.totalorder %v337_v61, %v343_v59  ;;  %v2568_v59 = vld [vmem:[%s4059_s3 + $0x258] sm:$0xff] }
  0x87   : > { %v2539_v58 = vsel %vm344_vm1, 1.0, %v4074_v38  ;;  %4253 = vst [vmem:[#allocation38_spill] sm:$0xff] %v2568_v59 }
  0x88   : > { %4249 = vst [vmem:[#allocation34_spill] sm:$0xff] %v2539_v58 }
  0x8f   : > { %v352_v62 = vpop.permute.xlu0 %351  ;;  %v355_v54 = vpop.permute.xlu1 %354 }
  0x90   : > { %vm356_vm0 = vcmp.eq.s32.totalorder %v337_v61, %v352_v62  ;;  %vm357_vm3 = vcmp.eq.s32.totalorder %v337_v61, %v355_v54  ;;  %v2549_v62 = vsel %vm345_vm4, 1.0, %v4074_v38  ;;  %v2574_v61 = vld [vmem:[%s4059_s3 + $0x218] sm:$0xff] }
  0x91   : > { %v2536_v35 = vsel %vm356_vm0, 1.0, %v4074_v38  ;;  %4251 = vst [vmem:[#allocation36_spill] sm:$0xff] %v2549_v62  ;;  %v2592_v54 = vld [vmem:[%s4059_s3 + $0x158] sm:$0xff] }
  0x92   : > { %4248 = vst [vmem:[#allocation33_spill] sm:$0xff] %v2536_v35 }
  0x93   : > { %4254 = vst [vmem:[#allocation39_spill] sm:$0xff] %v2574_v61 }
  0x94   : > { %4257 = vst [vmem:[#allocation42_spill] sm:$0xff] %v2592_v54 }
  0xa8   : > { %v534_v16 = vpop.f32.mrf.mxu0  ;;  %v554_v55 = vpop.f32.mrf.mxu1 }
  0xa9   : > { %v535_v29 = vadd.f32 %v534_v16, %v2521_v63  ;;  %v555_v41 = vadd.f32 %v554_v55, %v2529_v15  ;;  %v2546_v55 = vsel %vm357_vm3, 1.0, %v4074_v38  ;;  %v2580_v16 = vld [vmem:[%s4059_s3 + $0x1d8] sm:$0xff] }
  0xaa   : > { %4250 = vst [vmem:[#allocation35_spill] sm:$0xff] %v2546_v55  ;;  %v2598_v38 = vld [vmem:[%s4059_s3 + $0x118] sm:$0xff] }
  0xab   : > { %668 = vmatpush.msrb.mxu2 %v535_v29  ;;  %639 = vmatpush.msrb.mxu1 %v555_v41  ;;  %v2562_v41 = vld [vmem:[%s4059_s3 + $0x298] sm:$0xff]  ;;  %4255 = vst [vmem:[#allocation40_spill] sm:$0xff] %v2580_v16 }
  0xac   : > { %1887 = vmatmul.msk.f32.vlgmr.msrb.gmra.mxu2 %vm617_vm2, %v2539_v58  ;;  %1885 = vmatmul.msk.f32.vlgmr.msrb.gmra.mxu1 %vm617_vm2, %v2536_v35  ;;  %4252 = vst [vmem:[#allocation37_spill] sm:$0xff] %v2562_v41  ;;  %v2586_v29 = vld [vmem:[%s4059_s3 + $0x198] sm:$0xff] }
  0xad   : > { %582 = vmatpush.msra.mxu3 %v2562_v41  ;;  %4256 = vst [vmem:[#allocation41_spill] sm:$0xff] %v2586_v29  ;;  %v2616_v58 = vld [vmem:[%s4059_s3 + $0x58] sm:$0xff]  ;;  %718 = vmatpush.msra.mxu1 %v2631_v32  ;;  %v2660_v32 = vld [vmem:[%s4059_s3 + $0x370] sm:$0xff] }
  0xae   : > { %4258 = vst [vmem:[#allocation43_spill] sm:$0xff] %v2598_v38  ;;  %v2622_v35 = vld [vmem:[%s4059_s3 + $0x18] sm:$0xff]  ;;  %738 = vmatpush.msra.mxu2 %v2636_v28  ;;  %v2655_v28 = vld [vmem:[%s4059_s3 + $0x368] sm:$0xff] }
  0xaf   : > { %583 = vmatpush.msra.mxu3 %v2568_v59  ;;  %4261 = vst [vmem:[#allocation46_spill] sm:$0xff] %v2616_v58 }
  0xb0   : > { %4262 = vst [vmem:[#allocation47_spill] sm:$0xff] %v2622_v35  ;;  %739 = vmatpush.msra.mxu2 %v2648_v26 }
  0xb1   : > { %584 = vmatpush.msra.mxu3 %v2574_v61  ;;  %4268 = vst [vmem:[#allocation53_spill] sm:$0xff] %v2655_v28 }
  0xb2   : > { %4269 = vst [vmem:[#allocation54_spill] sm:$0xff] %v2660_v32  ;;  %740 = vmatpush.msra.mxu2 %v2660_v32  ;;  %v2684_v32 = vld [vmem:[%s4059_s3 + $0x2f0] sm:$0xff] }
  0xb3   : > { %585 = vmatpush.msra.mxu3 %v2580_v16  ;;  %4273 = vst [vmem:[#allocation58_spill] sm:$0xff] %v2684_v32 }
  0xb4   : > { %1888 = vmatmul.msk.f32.gmra.mxu2 %vm617_vm2, %v2549_v62  ;;  %1886 = vmatmul.msk.f32.gmra.mxu1 %vm617_vm2, %v2546_v55  ;;  %v2604_v62 = vld [vmem:[%s4059_s3 + $0xd8] sm:$0xff] }
  0xb5   : > { %586 = vmatpush.msra.mxu3 %v2586_v29  ;;  %4259 = vst [vmem:[#allocation44_spill] sm:$0xff] %v2604_v62  ;;  %v2610_v55 = vld [vmem:[%s4059_s3 + $0x98] sm:$0xff] }
  0xb6   : > { %4260 = vst [vmem:[#allocation45_spill] sm:$0xff] %v2610_v55 }
  0xb7   : > { %587 = vmatpush.msra.mxu3 %v2592_v54 }
  0xb8   : > { %v2625_v15 = vpop.f32.mrf.mxu2 }
  0xb9   : > { %588 = vmatpush.msra.mxu3 %v2598_v38  ;;  %4263 = vst [vmem:[#allocation48_spill] sm:$0xff] %v2625_v15  ;;  %v2643_v15 = vld [vmem:[%s4059_s3 + $0x3a8] sm:$0xff] }
  0xba   : > { %4266 = vst [vmem:[#allocation51_spill] sm:$0xff] %v2643_v15  ;;  %719 = vmatpush.msra.mxu1 %v2643_v15 }
  0xbb   : > { %589 = vmatpush.msra.mxu3 %v2604_v62 }
  0xbc   : > { %720 = vmatpush.msra.mxu1 %v2655_v28  ;;  %v2679_v28 = vld [vmem:[%s4059_s3 + $0x2e8] sm:$0xff] }
  0xbd   : > { %590 = vmatpush.msra.mxu3 %v2610_v55  ;;  %4272 = vst [vmem:[#allocation57_spill] sm:$0xff] %v2679_v28 }
  0xbf   : > { %591 = vmatpush.msra.mxu3 %v2616_v58 }
  0xc1   : > { %592 = vmatpush.msra.mxu3 %v2622_v35 }
  0xc2   : > { %593 = vmatmul.f32.vlgmr.msra.gmra.mxu3 %v2422_v42 }
 0x129   : > { %v641_v63 = vpop.f32.mrf.mxu1 }
 0x12f   : > { %v670_v24 = vpop.f32.mrf.mxu2 }
 0x130   : > { %v671_v21 = vadd.f32 %v670_v24, %v641_v63  ;;  %v2667_v24 = vld [vmem:[%s4059_s3 + $0x328] sm:$0xff]  ;;  %v2672_v63 = vld [vmem:[%s4059_s3 + $0x330] sm:$0xff] }
 0x131   : > { %4270 = vst [vmem:[#allocation55_spill] sm:$0xff] %v2667_v24  ;;  %721 = vmatpush.msra.mxu1 %v2667_v24  ;;  %741 = vmatpush.msra.mxu2 %v2672_v63  ;;  %v644_v26 = vpop.f32.mrf.mxu1  ;;  %v2696_v24 = vld [vmem:[%s4059_s3 + $0x2b0] sm:$0xff] }
 0x132   : > { %v678_v18 = vmul.f32 1.442695, %v671_v21  ;;  %4271 = vst [vmem:[#allocation56_spill] sm:$0xff] %v2672_v63  ;;  %v2691_v63 = vld [vmem:[%s4059_s3 + $0x2a8] sm:$0xff]  ;;  %vm676_vm6 = vcmp.gt.f32.partialorder %v671_v21, 0.0 }
 0x133   : > { %722 = vmatpush.msra.mxu1 %v2679_v28  ;;  %742 = vmatpush.msra.mxu2 %v2684_v32  ;;  %4274 = vst [vmem:[#allocation59_spill] sm:$0xff] %v2691_v63  ;;  %v2708_v32 = vld [vmem:[%s4059_s3 + $0x270] sm:$0xff] }
 0x134   : > { %1948 = vpow2.f32 %v678_v18  ;;  %4275 = vst [vmem:[#allocation60_spill] sm:$0xff] %v2696_v24  ;;  %v2703_v18 = vld [vmem:[%s4059_s3 + $0x268] sm:$0xff] }
 0x135   : > { %723 = vmatpush.msra.mxu1 %v2691_v63  ;;  %743 = vmatpush.msra.mxu2 %v2696_v24  ;;  %4276 = vst [vmem:[#allocation61_spill] sm:$0xff] %v2703_v18 }
 0x136   : > { %4277 = vst [vmem:[#allocation62_spill] sm:$0xff] %v2708_v32 }
 0x137   : > { %v673_v15 = vpop.f32.mrf.mxu2  ;;  %724 = vmatpush.msra.mxu1 %v2703_v18  ;;  %744 = vmatpush.msra.mxu2 %v2708_v32  ;;  %v2727_v32 = vld [vmem:[%s4059_s3 + $0x1e8] sm:$0xff]  ;;  %v2732_v18 = vld [vmem:[%s4059_s3 + $0x1f0] sm:$0xff] }
 0x138   : > { %v674_v13 = vadd.f32 %v673_v15, %v644_v26  ;;  %v2715_v26 = vld [vmem:[%s4059_s3 + $0x228] sm:$0xff]  ;;  %v2720_v15 = vld [vmem:[%s4059_s3 + $0x230] sm:$0xff]  ;;  %4280 = vst [vmem:[#allocation65_spill] sm:$0xff] %v2727_v32 }
 0x139   : > { %4278 = vst [vmem:[#allocation63_spill] sm:$0xff] %v2715_v26  ;;  %725 = vmatpush.msra.mxu1 %v2715_v26  ;;  %745 = vmatpush.msra.mxu2 %v2720_v15 }
 0x13a   : > { %v680_v28 = vmul.f32 1.442695, %v674_v13  ;;  %4279 = vst [vmem:[#allocation64_spill] sm:$0xff] %v2720_v15  ;;  %v1949_v24 = vpop.eup %1948  ;;  %v2744_v15 = vld [vmem:[%s4059_s3 + $0x1b0] sm:$0xff]  ;;  %vm677_vm5 = vcmp.gt.f32.partialorder %v674_v13, 0.0 }
 0x13b   : > { %4281 = vst [vmem:[#allocation66_spill] sm:$0xff] %v2732_v18  ;;  %726 = vmatpush.msra.mxu1 %v2727_v32  ;;  %746 = vmatpush.msra.mxu2 %v2732_v18  ;;  %v1889_v26 = vadd.f32 -1.0, %v1949_v24  ;;  %v2751_v32 = vld [vmem:[%s4059_s3 + $0x168] sm:$0xff]  ;;  %v2756_v18 = vld [vmem:[%s4059_s3 + $0x170] sm:$0xff] }
 0x13c   : > { %1950 = vpow2.f32 %v680_v28  ;;  %v2739_v28 = vld [vmem:[%s4059_s3 + $0x1a8] sm:$0xff]  ;;  %4283 = vst [vmem:[#allocation68_spill] sm:$0xff] %v2744_v15 }
 0x13d   : > { %4282 = vst [vmem:[#allocation67_spill] sm:$0xff] %v2739_v28  ;;  %727 = vmatpush.msra.mxu1 %v2739_v28  ;;  %747 = vmatpush.msra.mxu2 %v2744_v15  ;;  %v684_v11 = vmul.f32 1.6732632, %v1889_v26  ;;  %v4285_v28 = vlaneseq  ;;  %v1947_v15 = vld [vmem:[%s325_s25] ss:$0 sm:$0xff] }
 0x13e   : > { %4284 = vst [vmem:[#allocation69_spill] sm:$0xff] %v2756_v18 }
 0x13f   : > { %728 = vmatpush.msra.mxu1 %v2751_v32  ;;  %748 = vmatpush.msra.mxu2 %v2756_v18  ;;  %v363_v9 = vshrl.u32 %v4285_v28, 7  ;;  %v686_v1 = vsel %vm676_vm6, %v671_v21, %v684_v11  ;;  %v2773_v28 = vld [vmem:[%s4059_s3 + $0x3f8] sm:$0xff] }
 0x140   : > { %v688_v18 = vmul.f32 1.050701, %v686_v1  ;;  %4288 = vst [vmem:[#allocation71_spill] sm:$0xff] %v2773_v28  ;;  %v2786_v1 = vld [vmem:[%s4059_s3 + $0x378] sm:$0xff] }
 0x141   : > { %vm366_vm8 = vcmp.eq.s32.totalorder %v1947_v15, %v363_v9  ;;  %4290 = vst [vmem:[#allocation73_spill] sm:$0xff] %v2786_v1  ;;  %v2798_v9 = vld [vmem:[%s4059_s3 + $0x2f8] sm:$0xff] }
 0x142   : > { %v1951_v63 = vpop.eup %1950  ;;  %4292 = vst [vmem:[#allocation75_spill] sm:$0xff] %v2798_v9  ;;  %v2804_v11 = vld [vmem:[%s4059_s3 + $0x2b8] sm:$0xff] }
 0x143   : > { %v1890_v24 = vadd.f32 -1.0, %v1951_v63  ;;  %v4286_v63 = vmov 0.0   ;;  %4293 = vst [vmem:[#allocation76_spill] sm:$0xff] %v2804_v11  ;;  %v2816_v21 = vld [vmem:[%s4059_s3 + $0x238] sm:$0xff] }
 0x144   : > { %v2768_v26 = vsel %vm366_vm8, 1.0, %v4286_v63  ;;  %4295 = vst [vmem:[#allocation78_spill] sm:$0xff] %v2816_v21  ;;  %v2834_v15 = vld [vmem:[%s4059_s3 + $0x178] sm:$0xff]  ;;  %v2846_v63 = vld [vmem:[%s4059_s3 + $0x130] sm:$0xff] }
 0x145   : > { %v685_v7 = vmul.f32 1.6732632, %v1890_v24  ;;  %4287 = vst [vmem:[#allocation70_spill] sm:$0xff] %v2768_v26  ;;  %v2841_v24 = vld [vmem:[%s4059_s3 + $0x128] sm:$0xff]  ;;  %749 = vmatpush.msra.mxu2 %v2846_v63 }
 0x146   : > { %4298 = vst [vmem:[#allocation81_spill] sm:$0xff] %v2834_v15  ;;  %729 = vmatpush.msra.mxu1 %v2841_v24 }
 0x147   : > { %v687_v3 = vsel %vm677_vm5, %v674_v13, %v685_v7  ;;  %v2792_v7 = vld [vmem:[%s4059_s3 + $0x338] sm:$0xff] }
 0x148   : > { %v689_v35 = vmul.f32 1.050701, %v687_v3  ;;  %v2780_v3 = vld [vmem:[%s4059_s3 + $0x3b8] sm:$0xff]  ;;  %4291 = vst [vmem:[#allocation74_spill] sm:$0xff] %v2792_v7 }
 0x149   : > { %4289 = vst [vmem:[#allocation72_spill] sm:$0xff] %v2780_v3  ;;  %v2810_v13 = vld [vmem:[%s4059_s3 + $0x278] sm:$0xff] }
 0x14a   : > { %1891 = vmatpush.msk.msrb.mxu3 %vm694_vm7, %v689_v35  ;;  %4294 = vst [vmem:[#allocation77_spill] sm:$0xff] %v2810_v13  ;;  %v2822_v35 = vld [vmem:[%s4059_s3 + $0x1f8] sm:$0xff] }
 0x14b   : > { %4296 = vst [vmem:[#allocation79_spill] sm:$0xff] %v2822_v35 }
 0x14c   : > { %713 = vmatpush.msrb.mxu3 %v688_v18  ;;  %v2828_v18 = vld [vmem:[%s4059_s3 + $0x1b8] sm:$0xff] }
 0x14d   : > { %1892 = vmatmul.msk.f32.vlgmr.msrb.gmra.mxu3 %vm690_vm9, %v2768_v26  ;;  %4297 = vst [vmem:[#allocation80_spill] sm:$0xff] %v2828_v18  ;;  %v2943_v26 = vld [vmem:[%s4059_s3 + $0x360] sm:$0xff] }
 0x14e   : > { %758 = vmatpush.msra.mxu3 %v2773_v28  ;;  %v2924_v28 = vld [vmem:[%s4059_s3 + $0x30] sm:$0xff] }
 0x14f   : > { %4307 = vst [vmem:[#allocation90_spill] sm:$0xff] %v2924_v28 }
 0x150   : > { %759 = vmatpush.msra.mxu3 %v2780_v3  ;;  %v2919_v3 = vld [vmem:[%s4059_s3 + $0x28] sm:$0xff] }
 0x151   : > { %4306 = vst [vmem:[#allocation89_spill] sm:$0xff] %v2919_v3 }
 0x152   : > { %760 = vmatpush.msra.mxu3 %v2786_v1  ;;  %v2902_v1 = vld [vmem:[%s4059_s3 + $0x3e0] sm:$0xff] }
 0x153   : > { %597 = vmatpush.msrb.mxu0 %v2902_v1 }
 0x154   : > { %761 = vmatpush.msra.mxu3 %v2792_v7  ;;  %v2897_v7 = vld [vmem:[%s4059_s3 + $0x70] sm:$0xff] }
 0x155   : > { %4304 = vst [vmem:[#allocation87_spill] sm:$0xff] %v2897_v7 }
 0x156   : > { %762 = vmatpush.msra.mxu3 %v2798_v9  ;;  %v2886_v9 = vld [vmem:[%s4059_s3 + $0xb8] sm:$0xff] }
 0x157   : > { %4302 = vst [vmem:[#allocation85_spill] sm:$0xff] %v2886_v9 }
 0x158   : > { %763 = vmatpush.msra.mxu3 %v2804_v11  ;;  %v2879_v11 = vld [vmem:[%s4059_s3 + $0xb0] sm:$0xff] }
 0x159   : > { %4301 = vst [vmem:[#allocation84_spill] sm:$0xff] %v2879_v11 }
 0x15a   : > { %764 = vmatpush.msra.mxu3 %v2810_v13  ;;  %v2874_v13 = vld [vmem:[%s4059_s3 + $0xa8] sm:$0xff] }
 0x15c   : > { %765 = vmatpush.msra.mxu3 %v2816_v21  ;;  %v2868_v21 = vld [vmem:[%s4059_s3 + $0xf8] sm:$0xff] }
 0x15d   : > { %4300 = vst [vmem:[#allocation83_spill] sm:$0xff] %v2868_v21 }
 0x15e   : > { %766 = vmatpush.msra.mxu3 %v2822_v35  ;;  %v2851_v35 = vld [vmem:[%s4059_s3 + $0x138] sm:$0xff] }
 0x15f   : > { %4299 = vst [vmem:[#allocation82_spill] sm:$0xff] %v2851_v35 }
 0x160   : > { %767 = vmatpush.msra.mxu3 %v2828_v18  ;;  %v2863_v18 = vld [vmem:[%s4059_s3 + $0xf0] sm:$0xff] }
 0x161   : > { %750 = vmatpush.msra.mxu2 %v2863_v18 }
 0x162   : > { %768 = vmatpush.msra.mxu3 %v2834_v15  ;;  %v2858_v15 = vld [vmem:[%s4059_s3 + $0xe8] sm:$0xff] }
 0x163   : > { %730 = vmatpush.msra.mxu1 %v2858_v15  ;;  %751 = vmatpush.msra.mxu2 %v2879_v11 }
 0x164   : > { %769 = vmatpush.msra.mxu3 %v2851_v35  ;;  %v2892_v35 = vld [vmem:[%s4059_s3 + $0x68] sm:$0xff] }
 0x165   : > { %4303 = vst [vmem:[#allocation86_spill] sm:$0xff] %v2892_v35  ;;  %731 = vmatpush.msra.mxu1 %v2874_v13  ;;  %752 = vmatpush.msra.mxu2 %v2897_v7 }
 0x166   : > { %770 = vmatpush.msra.mxu3 %v2868_v21  ;;  %v2909_v21 = vld [vmem:[%s4059_s3 + $0x78] sm:$0xff] }
 0x167   : > { %4305 = vst [vmem:[#allocation88_spill] sm:$0xff] %v2909_v21  ;;  %732 = vmatpush.msra.mxu1 %v2892_v35  ;;  %753 = vmatpush.msra.mxu2 %v2924_v28 }
 0x168   : > { %771 = vmatpush.msra.mxu3 %v2886_v9  ;;  %v2929_v9 = vld [vmem:[%s4059_s3 + $0x38] sm:$0xff] }
 0x169   : > { %4308 = vst [vmem:[#allocation91_spill] sm:$0xff] %v2929_v9  ;;  %733 = vmatpush.msra.mxu1 %v2919_v3  ;;  %865 = vmatpush.msrb.mxu2 %v2277_v17  ;;  %v2961_v17 = vld [vmem:[%s4059_s3 + $0x2e0] sm:$0xff] }
 0x16a   : > { %772 = vmatpush.msra.mxu3 %v2909_v21  ;;  %v2938_v21 = vld [vmem:[%s4059_s3 + $0x3a0] sm:$0xff] }
 0x16b   : > { %845 = vmatpush.msrb.mxu1 %v2198_v2  ;;  %598 = vmatpush.msrb.mxu0 %v2938_v21  ;;  %v2952_v2 = vld [vmem:[%s4059_s3 + $0x320] sm:$0xff] }
 0x16c   : > { %773 = vmatpush.msra.mxu3 %v2929_v9  ;;  %866 = vmatpush.msrb.mxu2 %v2294_v20  ;;  %v3030_v20 = vpop.f32.mrf.mxu3  ;;  %v4328_v9 = vld [vmem:[#allocation48_spill] sm:$0xff] }
 0x16d   : > { %846 = vmatpush.msrb.mxu1 %v2209_v4  ;;  %599 = vmatpush.msrb.mxu0 %v2943_v26  ;;  %v2970_v4 = vld [vmem:[%s4059_s3 + $0x2a0] sm:$0xff] }
 0x16e   : > { %885 = vmatpush.msrb.mxu3 %v2494_v53  ;;  %867 = vmatpush.msrb.mxu2 %v2312_v23  ;;  %v3044_v23 = vld [vmem:[%s4059_s3 + $0xa0] sm:$0xff]  ;;  %v4313_v53 = vld [vmem:[#allocation5_spill] sm:$0xff] }
 0x16f   : > { %847 = vmatpush.msrb.mxu1 %v2216_v6  ;;  %600 = vmatpush.msrb.mxu0 %v2952_v2  ;;  %v2979_v6 = vld [vmem:[%s4059_s3 + $0x260] sm:$0xff] }
 0x170   : > { %886 = vmatpush.msrb.mxu3 %v2500_v56  ;;  %868 = vmatpush.msrb.mxu2 %v2355_v31  ;;  %v4309_v31 = vld [vmem:[#allocation47_spill] sm:$0xff]  ;;  %v4314_v56 = vld [vmem:[#allocation6_spill] sm:$0xff] }
 0x171   : > { %848 = vmatpush.msrb.mxu1 %v2232_v8  ;;  %601 = vmatpush.msrb.mxu0 %v2961_v17  ;;  %v2988_v8 = vld [vmem:[%s4059_s3 + $0x220] sm:$0xff] }
 0x172   : > { %887 = vmatpush.msrb.mxu3 %v2505_v57  ;;  %869 = vmatpush.msrb.mxu2 %v2373_v34  ;;  %v4315_v57 = vld [vmem:[#allocation7_spill] sm:$0xff] }
 0x173   : > { %849 = vmatpush.msrb.mxu1 %v2245_v10  ;;  %602 = vmatpush.msrb.mxu0 %v2970_v4  ;;  %v2997_v10 = vld [vmem:[%s4059_s3 + $0x1e0] sm:$0xff] }
 0x174   : > { %888 = vmatpush.msrb.mxu3 %v2516_v60  ;;  %870 = vmatpush.msrb.mxu2 %v2391_v37  ;;  %v4316_v60 = vld [vmem:[#allocation8_spill] sm:$0xff] }
 0x175   : > { %850 = vmatpush.msrb.mxu1 %v2260_v12  ;;  %603 = vmatpush.msrb.mxu0 %v2979_v6  ;;  %v3006_v12 = vld [vmem:[%s4059_s3 + $0x1a0] sm:$0xff] }
 0x176   : > { %889 = vmatpush.msrb.mxu3 %v2526_v5  ;;  %871 = vmatpush.msrb.mxu2 %v2412_v40  ;;  %v4317_v5 = vld [vmem:[#allocation9_spill] sm:$0xff] }
 0x177   : > { %851 = vmatpush.msrb.mxu1 %v2271_v14  ;;  %604 = vmatpush.msrb.mxu0 %v2988_v8  ;;  %v3015_v14 = vld [vmem:[%s4059_s3 + $0x160] sm:$0xff] }
 0x178   : > { %890 = vmatpush.msrb.mxu3 %v2562_v41  ;;  %872 = vmatpush.msrb.mxu2 %v2435_v44 }
 0x179   : > { %852 = vmatpush.msrb.mxu1 %v2289_v19  ;;  %605 = vmatpush.msrb.mxu0 %v2997_v10  ;;  %v3024_v19 = vld [vmem:[%s4059_s3 + $0x120] sm:$0xff] }
 0x17a   : > { %891 = vmatpush.msrb.mxu3 %v2568_v59  ;;  %873 = vmatpush.msrb.mxu2 %v2443_v45 }
 0x17b   : > { %853 = vmatpush.msrb.mxu1 %v2307_v22  ;;  %606 = vmatpush.msrb.mxu0 %v3006_v12  ;;  %v3035_v22 = vld [vmem:[%s4059_s3 + $0xe0] sm:$0xff] }
 0x17c   : > { %892 = vmatpush.msrb.mxu3 %v2574_v61  ;;  %874 = vmatpush.msrb.mxu2 %v2450_v46 }
 0x17d   : > { %854 = vmatpush.msrb.mxu1 %v2325_v25  ;;  %607 = vmatpush.msrb.mxu0 %v3015_v14  ;;  %v3053_v25 = vld [vmem:[%s4059_s3 + $0x60] sm:$0xff] }
 0x17e   : > { %893 = vmatpush.msrb.mxu3 %v2580_v16  ;;  %875 = vmatpush.msrb.mxu2 %v2456_v47  ;;  %v4325_v16 = vld [vmem:[#allocation30_spill] sm:$0xff] }
 0x17f   : > { %855 = vmatpush.msrb.mxu1 %v2338_v27  ;;  %608 = vmatpush.msrb.mxu0 %v3024_v19  ;;  %v3062_v27 = vld [vmem:[%s4059_s3 + $0x20] sm:$0xff]  ;;  %v3111_v61 = vperm.slane %v4325_v16, 2 }
 0x180   : > { %894 = vmatpush.msrb.mxu3 %v2586_v29  ;;  %876 = vmatpush.msrb.mxu2 %v2462_v48  ;;  %v509_v29 = vld [vmem:[%s4060_s4 + $0x5] sm:$0x7] }
 0x181   : > { %856 = vmatpush.msrb.mxu1 %v2350_v30  ;;  %609 = vmatpush.msrb.mxu0 %v3035_v22  ;;  %v3113_v59 = vperm.slane %v509_v29, 0 }
 0x182   : > { %895 = vmatpush.msrb.mxu3 %v2592_v54  ;;  %877 = vmatpush.msrb.mxu2 %v2468_v49  ;;  %v4324_v54 = vld [vmem:[#allocation19_spill] sm:$0xff]  ;;  %v3121_v49 = vperm.slane %v509_v29, 1 }
 0x183   : > { %857 = vmatpush.msrb.mxu1 %v2367_v33  ;;  %610 = vmatpush.msrb.mxu0 %v3044_v23  ;;  %v4310_v33 = vld [vmem:[#allocation2_spill] sm:$0xff] }
 0x184   : > { %896 = vmatpush.msrb.mxu3 %v2598_v38  ;;  %878 = vmatpush.msrb.mxu2 %v2474_v50  ;;  %v4323_v38 = vld [vmem:[#allocation17_spill] sm:$0xff]  ;;  %4326 = vst [vmem:[#allocation2_spill] sm:$0xff] %v3111_v61 }
 0x185   : > { %858 = vmatpush.msrb.mxu1 %v2386_v36  ;;  %611 = vmatpush.msrb.mxu0 %v3053_v25  ;;  %v4311_v36 = vld [vmem:[#allocation3_spill] sm:$0xff]  ;;  %4330 = vst [vmem:[#allocation5_spill] sm:$0xff] %v3121_v49 }
 0x186   : > { %897 = vmatpush.msrb.mxu3 %v2604_v62  ;;  %879 = vmatpush.msrb.mxu2 %v2480_v51  ;;  %v4322_v62 = vld [vmem:[#allocation15_spill] sm:$0xff]  ;;  %4327 = vst [vmem:[#allocation3_spill] sm:$0xff] %v3113_v59  ;;  %v3119_v51 = vperm.slane %v4325_v16, 3 }
 0x187   : > { %859 = vmatpush.msrb.mxu1 %v2407_v39  ;;  %612 = vmatpush.msrb.mxu0 %v3062_v27  ;;  %v4312_v39 = vld [vmem:[#allocation4_spill] sm:$0xff] }
 0x188   : > { %898 = vmatpush.msrb.mxu3 %v2610_v55  ;;  %613 = vmatmul.f32.vlgmr.msrb.gmra.mxu0 %v2422_v42  ;;  %v4321_v55 = vld [vmem:[#allocation13_spill] sm:$0xff]  ;;  %4329 = vst [vmem:[#allocation4_spill] sm:$0xff] %v3119_v51  ;;  %v595_v46 = vadd.f32 %v3030_v20, %v3119_v51 }
 0x189   : > { %860 = vmatpush.msrb.mxu1 %v2427_v43  ;;  %880 = vmatpush.msrb.mxu2 %v2486_v52  ;;  %v575_v52 = vadd.f32 %v4328_v9, %v3111_v61 }
 0x18a   : > { %899 = vmatpush.msrb.mxu3 %v2616_v58  ;;  %825 = vmatpush.msra.mxu0 %v2187_v0  ;;  %v4319_v58 = vld [vmem:[#allocation11_spill] sm:$0xff] }
 0x18c   : > { %900 = vmatpush.msrb.mxu3 %v4309_v31  ;;  %826 = vmatpush.msra.mxu0 %v4310_v33  ;;  %v4320_v31 = vld [vmem:[#allocation12_spill] sm:$0xff] }
 0x18e   : > { %827 = vmatpush.msra.mxu0 %v4311_v36 }
 0x190   : > { %828 = vmatpush.msra.mxu0 %v4312_v39 }
 0x192   : > { %829 = vmatpush.msra.mxu0 %v4313_v53 }
 0x194   : > { %830 = vmatpush.msra.mxu0 %v4314_v56 }
 0x196   : > { %831 = vmatpush.msra.mxu0 %v4315_v57 }
 0x198   : > { %832 = vmatpush.msra.mxu0 %v4316_v60 }
 0x19a   : > { %833 = vmatpush.msra.mxu0 %v4317_v5 }
 0x1d0   : > { %v715_v30 = vpop.f32.mrf.mxu3 }
 0x1d1   : > { %734 = vmatmul.f32.vlgmr.msra.gmra.mxu1 %v715_v30  ;;  %754 = vmatmul.f32.vlgmr.msra.gmra.mxu2 %v715_v30 }
 0x1d2   : > { %774 = vmatmul.f32.vlgmr.msra.gmra.mxu3 %v715_v30  ;;  %v4318_v30 = vld [vmem:[#allocation10_spill] sm:$0xff] }
 0x1d3   : > { %834 = vmatpush.msra.mxu0 %v4318_v30 }
 0x1d5   : > { %835 = vmatpush.msra.mxu0 %v4319_v58 }
 0x1d7   : > { %836 = vmatpush.msra.mxu0 %v4320_v31 }
 0x1d9   : > { %837 = vmatpush.msra.mxu0 %v4321_v55 }
 0x1db   : > { %838 = vmatpush.msra.mxu0 %v4322_v62 }
 0x1dd   : > { %839 = vmatpush.msra.mxu0 %v4323_v38 }
 0x1df   : > { %840 = vmatpush.msra.mxu0 %v4324_v54 }
 0x1e1   : > { %905 = vmatpush.msrb.mxu0 %v2902_v1 }
 0x1e3   : > { %906 = vmatpush.msrb.mxu0 %v2938_v21 }
 0x1e5   : > { %907 = vmatpush.msrb.mxu0 %v2943_v26 }
 0x1e7   : > { %908 = vmatpush.msrb.mxu0 %v2952_v2 }
 0x1e9   : > { %909 = vmatpush.msrb.mxu0 %v2961_v17 }
 0x1eb   : > { %910 = vmatpush.msrb.mxu0 %v2970_v4 }
 0x1ed   : > { %911 = vmatpush.msrb.mxu0 %v2979_v6 }
 0x1ef   : > { %912 = vmatpush.msrb.mxu0 %v2988_v8 }
 0x1f1   : > { %913 = vmatpush.msrb.mxu0 %v2997_v10 }
 0x1f3   : > { %914 = vmatpush.msrb.mxu0 %v3006_v12 }
 0x1f5   : > { %915 = vmatpush.msrb.mxu0 %v3015_v14 }
 0x1f7   : > { %916 = vmatpush.msrb.mxu0 %v3024_v19 }
 0x1f9   : > { %917 = vmatpush.msrb.mxu0 %v3035_v22 }
 0x1fb   : > { %918 = vmatpush.msrb.mxu0 %v3044_v23 }
 0x1fd   : > { %919 = vmatpush.msrb.mxu0 %v3053_v25 }
 0x1ff   : > { %920 = vmatpush.msrb.mxu0 %v3062_v27 }
 0x205   : > { %v614_v34 = vpop.f32.mrf.mxu0 }
 0x24e   : > { %v735_v41 = vpop.f32.mrf.mxu1 }
 0x24f   : > { %v736_v43 = vadd.f32 %v735_v41, %v3113_v59 }
 0x251   : > { %v778_v50 = vadd.f32 %v736_v43, %v575_v52 }
 0x253   : > { %v1893_v48 = vmul.f32 -1.442695, %v778_v50  ;;  %v3127_v50 = vperm.slane %v4325_v16, 4 }
 0x254   : > { %v755_v47 = vpop.f32.mrf.mxu2 }
 0x255   : > { %1952 = vpow2.f32 %v1893_v48  ;;  %v756_v45 = vadd.f32 %v755_v47, %v3121_v49 }
 0x257   : > { %v798_v44 = vadd.f32 %v756_v45, %v595_v46  ;;  %v615_v46 = vadd.f32 %v614_v34, %v3127_v50 }
 0x259   : > { %v1894_v40 = vmul.f32 -1.442695, %v798_v44  ;;  %v3129_v44 = vperm.slane %v509_v29, 2 }
 0x25b   : > { %v1953_v37 = vpop.eup %1952  ;;  %1954 = vpow2.f32 %v1894_v40 }
 0x25c   : > { %v782_v9 = vadd.f32 1.0, %v1953_v37  ;;  %v775_v37 = vpop.f32.mrf.mxu3 }
 0x25e   : > { %1956 = vrcp.f32 %v782_v9  ;;  %v794_v20 = vand.u32 2147483648, %v782_v9  ;;  %v792_v47 = vand.u32 2147483647, %v782_v9  ;;  %vm788_vm11 = vweird.f32 %v782_v9 }
 0x260   : > { %v795_v49 = vor.u32 1.1754944e-38, %v794_v20  ;;  %vm793_vm13 = vcmp.eq.f32.partialorder %v792_v47, 8.507059e+37 }
 0x261   : > { %v1955_v41 = vpop.eup %1954 }
 0x262   : > { %v802_v59 = vadd.f32 1.0, %v1955_v41 }
 0x264   : > { %v1957_v61 = vpop.eup %1956  ;;  %1958 = vrcp.f32 %v802_v59  ;;  %v814_v3 = vand.u32 2147483648, %v802_v59  ;;  %v812_v29 = vand.u32 2147483647, %v802_v59  ;;  %vm808_vm15 = vweird.f32 %v802_v59 }
 0x265   : > { %v784_v43 = vmul.f32 %v1957_v61, %v782_v9  ;;  %vm789_vm10 = vweird.f32 %v1957_v61 }
 0x266   : > { %vm790_vm12 = vmor %vm788_vm11, %vm789_vm10  ;;  %v815_v34 = vor.u32 1.1754944e-38, %v814_v3  ;;  %vm813_vm1 = vcmp.eq.f32.partialorder %v812_v29, 8.507059e+37  ;;  %v4337_v3 = vld [vmem:[#allocation51_spill] sm:$0xff]  ;;  %v4358_v29 = vld [vmem:[#allocation84_spill] sm:$0xff] }
 0x267   : > { %v785_v52 = vsub.f32 1.0, %v784_v43  ;;  %v776_v43 = vadd.f32 %v775_v37, %v3129_v44  ;;  %v4352_v37 = vld [vmem:[#allocation64_spill] sm:$0xff] }
 0x269   : > { %v786_v48 = vmul.f32 %v1957_v61, %v785_v52 }
 0x26a   : > { %v1959_v45 = vpop.eup %1958 }
 0x26b   : > { %v804_v40 = vmul.f32 %v1959_v45, %v802_v59  ;;  %v787_v41 = vadd.f32 %v1957_v61, %v786_v48  ;;  %vm809_vm14 = vweird.f32 %v1959_v45  ;;  %v4334_v59 = vld [vmem:[#allocation34_spill] sm:$0xff] }
 0x26c   : > { %vm810_vm0 = vmor %vm808_vm15, %vm809_vm14 }
 0x26d   : > { %v805_v51 = vsub.f32 1.0, %v804_v40  ;;  %v791_v16 = vsel %vm790_vm12, %v1957_v61, %v787_v41  ;;  %v4354_v41 = vld [vmem:[#allocation66_spill] sm:$0xff] }
 0x26e   : > { %v796_v28 = vsel %vm793_vm13, %v795_v49, %v791_v16  ;;  %v4355_v16 = vld [vmem:[#allocation67_spill] sm:$0xff] }
 0x26f   : > { %v806_v52 = vmul.f32 %v1959_v45, %v805_v51  ;;  %v818_v7 = vmul.f32 %v796_v28, %v615_v46  ;;  %v4336_v28 = vld [vmem:[#allocation50_spill] sm:$0xff]  ;;  %v4353_v46 = vld [vmem:[#allocation65_spill] sm:$0xff] }
 0x271   : > { %v807_v35 = vadd.f32 %v1959_v45, %v806_v52  ;;  %v819_v11 = vadd.f32 %v818_v7, %v776_v43  ;;  %v4338_v7 = vld [vmem:[#allocation52_spill] sm:$0xff]  ;;  %v4357_v52 = vld [vmem:[#allocation69_spill] sm:$0xff] }
 0x272   : > { %v4356_v43 = vld [vmem:[#allocation68_spill] sm:$0xff] }
 0x273   : > { %v811_v48 = vsel %vm810_vm0, %v1959_v45, %v807_v35  ;;  %1960 = vtanh.f32 %v819_v11  ;;  %v4339_v11 = vld [vmem:[#allocation53_spill] sm:$0xff]  ;;  %v4340_v35 = vld [vmem:[#allocation54_spill] sm:$0xff]  ;;  %v4351_v45 = vld [vmem:[#allocation63_spill] sm:$0xff] }
 0x274   : > { %v816_v9 = vsel %vm813_vm1, %v815_v34, %v811_v48  ;;  %v4359_v34 = vld [vmem:[#allocation86_spill] sm:$0xff]  ;;  %v4360_v48 = vld [vmem:[#allocation87_spill] sm:$0xff] }
 0x275   : > { %v821_v20 = vsub.f32 1.0, %v816_v9  ;;  %v823_v40 = vmul.f32 %v816_v9, %v2422_v42  ;;  %v4331_v42 = vld [vmem:[#allocation31_spill] sm:$0xff]  ;;  %v4361_v9 = vld [vmem:[#allocation89_spill] sm:$0xff] }
 0x279   : > { %v1961_v61 = vpop.eup %1960 }
 0x27a   : > { %v822_v47 = vmul.f32 %v1961_v61, %v821_v20  ;;  %v3230_v20 = vld [vmem:[%s4059_s3 + $0x388] sm:$0xff]  ;;  %v3236_v61 = vld [vmem:[%s4059_s3 + $0x390] sm:$0xff] }
 0x27c   : > { %v3134_v49 = vadd.f32 %v823_v40, %v822_v47  ;;  %v3242_v47 = vld [vmem:[%s4059_s3 + $0x348] sm:$0xff]  ;;  %v3248_v40 = vld [vmem:[%s4059_s3 + $0x350] sm:$0xff] }
 0x27e   : > { %841 = vmatmul.f32.vlgmr.msra.gmra.mxu0 %v3134_v49  ;;  %861 = vmatmul.f32.vlgmr.msrb.gmra.mxu1 %v3134_v49 }
 0x27f   : > { %881 = vmatmul.f32.vlgmr.msrb.gmra.mxu2 %v3134_v49  ;;  %901 = vmatmul.f32.vlgmr.msrb.gmra.mxu3 %v3134_v49 }
 0x280   : > { %1115 = vmatpush.msra.mxu0 %v2187_v0 }
 0x282   : > { %1116 = vmatpush.msra.mxu0 %v4310_v33  ;;  %v4342_v33 = vld [vmem:[#allocation56_spill] sm:$0xff] }
 0x284   : > { %1117 = vmatpush.msra.mxu0 %v4311_v36  ;;  %v4343_v36 = vld [vmem:[#allocation35_spill] sm:$0xff] }
 0x286   : > { %921 = vmatmul.f32.vlgmr.msrb.gmra.mxu0 %v3134_v49 }
 0x287   : > { %1118 = vmatpush.msra.mxu0 %v4312_v39  ;;  %v4344_v39 = vld [vmem:[#allocation36_spill] sm:$0xff] }
 0x289   : > { %1119 = vmatpush.msra.mxu0 %v4313_v53  ;;  %v4345_v53 = vld [vmem:[#allocation57_spill] sm:$0xff] }
 0x28b   : > { %1120 = vmatpush.msra.mxu0 %v4314_v56  ;;  %v4346_v56 = vld [vmem:[#allocation58_spill] sm:$0xff] }
 0x28d   : > { %1121 = vmatpush.msra.mxu0 %v4315_v57  ;;  %v4347_v57 = vld [vmem:[#allocation59_spill] sm:$0xff] }
 0x28f   : > { %1122 = vmatpush.msra.mxu0 %v4316_v60  ;;  %v4348_v60 = vld [vmem:[#allocation60_spill] sm:$0xff] }
 0x291   : > { %1123 = vmatpush.msra.mxu0 %v4317_v5  ;;  %v4349_v5 = vld [vmem:[#allocation61_spill] sm:$0xff] }
 0x293   : > { %1124 = vmatpush.msra.mxu0 %v4318_v30  ;;  %v4350_v30 = vld [vmem:[#allocation62_spill] sm:$0xff] }
 0x295   : > { %1125 = vmatpush.msra.mxu0 %v4319_v58  ;;  %v4332_v58 = vld [vmem:[#allocation32_spill] sm:$0xff] }
 0x297   : > { %1126 = vmatpush.msra.mxu0 %v4320_v31  ;;  %v4341_v31 = vld [vmem:[#allocation55_spill] sm:$0xff] }
 0x299   : > { %1127 = vmatpush.msra.mxu0 %v4321_v55 }
 0x29b   : > { %1128 = vmatpush.msra.mxu0 %v4322_v62  ;;  %v4333_v62 = vld [vmem:[#allocation33_spill] sm:$0xff] }
 0x29d   : > { %1129 = vmatpush.msra.mxu0 %v4323_v38 }
 0x29f   : > { %1130 = vmatpush.msra.mxu0 %v4324_v54  ;;  %v4335_v54 = vld [vmem:[#allocation49_spill] sm:$0xff] }
 0x2a1   : > { %1195 = vmatpush.msrb.mxu0 %v2902_v1 }
 0x2a3   : > { %1196 = vmatpush.msrb.mxu0 %v2938_v21 }
 0x2a5   : > { %1197 = vmatpush.msrb.mxu0 %v2943_v26 }
 0x2a7   : > { %1198 = vmatpush.msrb.mxu0 %v2952_v2 }
 0x2a9   : > { %1199 = vmatpush.msrb.mxu0 %v2961_v17 }
 0x2ab   : > { %1200 = vmatpush.msrb.mxu0 %v2970_v4 }
 0x2ad   : > { %1201 = vmatpush.msrb.mxu0 %v2979_v6 }
 0x2af   : > { %1202 = vmatpush.msrb.mxu0 %v2988_v8 }
 0x2b1   : > { %1203 = vmatpush.msrb.mxu0 %v2997_v10 }
 0x2b3   : > { %1204 = vmatpush.msrb.mxu0 %v3006_v12 }
 0x2b5   : > { %1205 = vmatpush.msrb.mxu0 %v3015_v14 }
 0x2b7   : > { %1206 = vmatpush.msrb.mxu0 %v3024_v19 }
 0x2b9   : > { %1207 = vmatpush.msrb.mxu0 %v3035_v22 }
 0x2bb   : > { %1208 = vmatpush.msrb.mxu0 %v3044_v23 }
 0x2bd   : > { %1209 = vmatpush.msrb.mxu0 %v3053_v25 }
 0x2bf   : > { %1210 = vmatpush.msrb.mxu0 %v3062_v27 }
 0x2fb   : > { %v842_v0 = vpop.f32.mrf.mxu0  ;;  %v862_v38 = vpop.f32.mrf.mxu1 }
 0x2fc   : > { %v843_v51 = vadd.f32 %v842_v0, %v4331_v42  ;;  %v863_v55 = vadd.f32 %v862_v38, %v4332_v58  ;;  %v3254_v0 = vld [vmem:[%s4059_s3 + $0x308] sm:$0xff]  ;;  %v3260_v38 = vld [vmem:[%s4059_s3 + $0x310] sm:$0xff] }
 0x2fe   : > { %940 = vmatpush.msra.mxu1 %v863_v55  ;;  %963 = vmatpush.msra.mxu2 %v843_v51  ;;  %v3266_v51 = vld [vmem:[%s4059_s3 + $0x2c8] sm:$0xff]  ;;  %v4364_v55 = vld [vmem:[#allocation14_spill] sm:$0xff] }
 0x2ff   : > { %1895 = vmatmul.msk.f32.vlgmr.msra.gmra.mxu1 %vm617_vm2, %v4333_v62  ;;  %1897 = vmatmul.msk.f32.vlgmr.msra.gmra.mxu2 %vm617_vm2, %v4334_v59  ;;  %4363 = vst [vmem:[#allocation6_spill] sm:$0xff] %v3266_v51 }
 0x300   : > { %1008 = vmatpush.msrb.mxu1 %v4335_v54  ;;  %1028 = vmatpush.msrb.mxu2 %v4336_v28  ;;  %v3273_v54 = vld [vmem:[%s4059_s3 + $0x288] sm:$0xff]  ;;  %v4366_v28 = vld [vmem:[#allocation16_spill] sm:$0xff] }
 0x301   : > { %4365 = vst [vmem:[#allocation7_spill] sm:$0xff] %v3273_v54 }
 0x302   : > { %1009 = vmatpush.msrb.mxu1 %v4337_v3  ;;  %1029 = vmatpush.msrb.mxu2 %v4338_v7  ;;  %v3280_v3 = vld [vmem:[%s4059_s3 + $0x248] sm:$0xff]  ;;  %v4368_v7 = vld [vmem:[#allocation18_spill] sm:$0xff] }
 0x303   : > { %4367 = vst [vmem:[#allocation8_spill] sm:$0xff] %v3280_v3 }
 0x304   : > { %1010 = vmatpush.msrb.mxu1 %v4339_v11  ;;  %1030 = vmatpush.msrb.mxu2 %v4340_v35  ;;  %v3287_v11 = vld [vmem:[%s4059_s3 + $0x208] sm:$0xff]  ;;  %v4370_v35 = vld [vmem:[#allocation21_spill] sm:$0xff] }
 0x305   : > { %4369 = vst [vmem:[#allocation9_spill] sm:$0xff] %v3287_v11 }
 0x306   : > { %1011 = vmatpush.msrb.mxu1 %v4341_v31  ;;  %1031 = vmatpush.msrb.mxu2 %v4342_v33  ;;  %v3294_v31 = vld [vmem:[%s4059_s3 + $0x1c8] sm:$0xff]  ;;  %v4372_v33 = vld [vmem:[#allocation22_spill] sm:$0xff] }
 0x307   : > { %1896 = vmatmul.msk.f32.gmra.mxu1 %vm617_vm2, %v4343_v36  ;;  %1898 = vmatmul.msk.f32.gmra.mxu2 %vm617_vm2, %v4344_v39  ;;  %4371 = vst [vmem:[#allocation10_spill] sm:$0xff] %v3294_v31 }
 0x308   : > { %1012 = vmatpush.msrb.mxu1 %v4345_v53  ;;  %1032 = vmatpush.msrb.mxu2 %v4346_v56  ;;  %v3301_v53 = vld [vmem:[%s4059_s3 + $0x188] sm:$0xff] }
 0x309   : > { %4373 = vst [vmem:[#allocation11_spill] sm:$0xff] %v3301_v53  ;;  %v4374_v56 = vld [vmem:[#allocation23_spill] sm:$0xff] }
 0x30a   : > { %1013 = vmatpush.msrb.mxu1 %v4347_v57  ;;  %1033 = vmatpush.msrb.mxu2 %v4348_v60  ;;  %v3308_v57 = vld [vmem:[%s4059_s3 + $0x148] sm:$0xff]  ;;  %v4376_v60 = vld [vmem:[#allocation24_spill] sm:$0xff] }
 0x30b   : > { %4375 = vst [vmem:[#allocation12_spill] sm:$0xff] %v3308_v57 }
 0x30c   : > { %1014 = vmatpush.msrb.mxu1 %v4349_v5  ;;  %1034 = vmatpush.msrb.mxu2 %v4350_v30  ;;  %v3315_v5 = vld [vmem:[%s4059_s3 + $0x108] sm:$0xff]  ;;  %v4378_v30 = vld [vmem:[#allocation25_spill] sm:$0xff] }
 0x30d   : > { %4377 = vst [vmem:[#allocation13_spill] sm:$0xff] %v3315_v5 }
 0x30e   : > { %1015 = vmatpush.msrb.mxu1 %v4351_v45  ;;  %1035 = vmatpush.msrb.mxu2 %v4352_v37  ;;  %v3322_v45 = vld [vmem:[%s4059_s3 + $0xc8] sm:$0xff]  ;;  %v4380_v37 = vld [vmem:[#allocation26_spill] sm:$0xff] }
 0x30f   : > { %4379 = vst [vmem:[#allocation15_spill] sm:$0xff] %v3322_v45 }
 0x310   : > { %1016 = vmatpush.msrb.mxu1 %v4353_v46  ;;  %1036 = vmatpush.msrb.mxu2 %v4354_v41  ;;  %v3329_v46 = vld [vmem:[%s4059_s3 + $0x88] sm:$0xff] }
 0x311   : > { %4381 = vst [vmem:[#allocation17_spill] sm:$0xff] %v3329_v46  ;;  %v4382_v41 = vld [vmem:[#allocation27_spill] sm:$0xff] }
 0x312   : > { %1017 = vmatpush.msrb.mxu1 %v4355_v16  ;;  %1037 = vmatpush.msrb.mxu2 %v4356_v43  ;;  %v3336_v16 = vld [vmem:[%s4059_s3 + $0x48] sm:$0xff]  ;;  %v4384_v43 = vld [vmem:[#allocation28_spill] sm:$0xff] }
 0x313   : > { %4383 = vst [vmem:[#allocation19_spill] sm:$0xff] %v3336_v16 }
 0x314   : > { %1018 = vmatpush.msrb.mxu1 %v2751_v32  ;;  %1038 = vmatpush.msrb.mxu2 %v4357_v52  ;;  %v4362_v32 = vld [vmem:[#allocation90_spill] sm:$0xff]  ;;  %v4385_v52 = vld [vmem:[#allocation20_spill] sm:$0xff] }
 0x316   : > { %1019 = vmatpush.msrb.mxu1 %v2841_v24  ;;  %1039 = vmatpush.msrb.mxu2 %v2846_v63  ;;  %v3218_v24 = vld [vmem:[%s4059_s3 + $0x3c8] sm:$0xff]  ;;  %v3224_v63 = vld [vmem:[%s4059_s3 + $0x3d0] sm:$0xff] }
 0x318   : > { %1020 = vmatpush.msrb.mxu1 %v2858_v15  ;;  %1040 = vmatpush.msrb.mxu2 %v2863_v18 }
 0x31a   : > { %1021 = vmatpush.msrb.mxu1 %v2874_v13  ;;  %1041 = vmatpush.msrb.mxu2 %v4358_v29 }
 0x31c   : > { %1022 = vmatpush.msrb.mxu1 %v4359_v34  ;;  %1042 = vmatpush.msrb.mxu2 %v4360_v48 }
 0x31e   : > { %1023 = vmatpush.msrb.mxu1 %v4361_v9  ;;  %1043 = vmatpush.msrb.mxu2 %v4362_v32 }
 0x320   : > { %1135 = vmatpush.msra.mxu1 %v3218_v24  ;;  %1155 = vmatpush.msra.mxu2 %v3224_v63 }
 0x322   : > { %1136 = vmatpush.msra.mxu1 %v3230_v20  ;;  %1156 = vmatpush.msra.mxu2 %v3236_v61 }
 0x324   : > { %1137 = vmatpush.msra.mxu1 %v3242_v47  ;;  %1157 = vmatpush.msra.mxu2 %v3248_v40 }
 0x326   : > { %1138 = vmatpush.msra.mxu1 %v3254_v0  ;;  %1158 = vmatpush.msra.mxu2 %v3260_v38 }
 0x328   : > { %1139 = vmatpush.msra.mxu1 %v3266_v51  ;;  %1159 = vmatpush.msra.mxu2 %v4364_v55  ;;  %v4386_v55 = vld [vmem:[#allocation29_spill] sm:$0xff] }
 0x32a   : > { %1140 = vmatpush.msra.mxu1 %v3273_v54  ;;  %1160 = vmatpush.msra.mxu2 %v4366_v28  ;;  %v3342_v28 = vpop.f32.mrf.mxu2 }
 0x32c   : > { %1141 = vmatpush.msra.mxu1 %v3280_v3  ;;  %1161 = vmatpush.msra.mxu2 %v4368_v7 }
 0x32e   : > { %1142 = vmatpush.msra.mxu1 %v3287_v11  ;;  %1162 = vmatpush.msra.mxu2 %v4370_v35 }
 0x330   : > { %1143 = vmatpush.msra.mxu1 %v3294_v31  ;;  %1163 = vmatpush.msra.mxu2 %v4372_v33 }
 0x332   : > { %1144 = vmatpush.msra.mxu1 %v3301_v53  ;;  %1164 = vmatpush.msra.mxu2 %v4374_v56 }
 0x334   : > { %1145 = vmatpush.msra.mxu1 %v3308_v57  ;;  %1165 = vmatpush.msra.mxu2 %v4376_v60 }
 0x336   : > { %1146 = vmatpush.msra.mxu1 %v3315_v5  ;;  %1166 = vmatpush.msra.mxu2 %v4378_v30 }
 0x338   : > { %1147 = vmatpush.msra.mxu1 %v3322_v45  ;;  %1167 = vmatpush.msra.mxu2 %v4380_v37 }
 0x33a   : > { %1148 = vmatpush.msra.mxu1 %v3329_v46  ;;  %1168 = vmatpush.msra.mxu2 %v4382_v41 }
 0x33c   : > { %1149 = vmatpush.msra.mxu1 %v3336_v16  ;;  %1169 = vmatpush.msra.mxu2 %v4384_v43 }
 0x33e   : > { %1150 = vmatpush.msra.mxu1 %v4385_v52  ;;  %1170 = vmatpush.msra.mxu2 %v4386_v55 }
 0x37c   : > { %v942_v7 = vpop.f32.mrf.mxu1 }
 0x382   : > { %v965_v35 = vpop.f32.mrf.mxu2 }
 0x383   : > { %v966_v33 = vadd.f32 %v965_v35, %v942_v7  ;;  %v4387_v35 = vld [vmem:[#allocation70_spill] sm:$0xff] }
 0x384   : > { %v945_v60 = vpop.f32.mrf.mxu1 }
 0x385   : > { %v973_v56 = vmul.f32 1.442695, %v966_v33  ;;  %vm971_vm3 = vcmp.gt.f32.partialorder %v966_v33, 0.0 }
 0x387   : > { %1962 = vpow2.f32 %v973_v56  ;;  %v4388_v56 = vld [vmem:[#allocation71_spill] sm:$0xff] }
 0x38a   : > { %v968_v30 = vpop.f32.mrf.mxu2 }
 0x38b   : > { %v969_v37 = vadd.f32 %v968_v30, %v945_v60  ;;  %v4389_v60 = vld [vmem:[#allocation72_spill] sm:$0xff] }
 0x38c   : > { %v4397_v30 = vld [vmem:[#allocation80_spill] sm:$0xff] }
 0x38d   : > { %v975_v41 = vmul.f32 1.442695, %v969_v37  ;;  %v1963_v46 = vpop.eup %1962  ;;  %vm972_vm4 = vcmp.gt.f32.partialorder %v969_v37, 0.0 }
 0x38e   : > { %v1899_v16 = vadd.f32 -1.0, %v1963_v46  ;;  %v4390_v46 = vld [vmem:[#allocation73_spill] sm:$0xff] }
 0x38f   : > { %1964 = vpow2.f32 %v975_v41  ;;  %v4399_v41 = vld [vmem:[#allocation82_spill] sm:$0xff] }
 0x390   : > { %v979_v43 = vmul.f32 1.6732632, %v1899_v16  ;;  %v4393_v16 = vld [vmem:[#allocation76_spill] sm:$0xff] }
 0x392   : > { %v981_v57 = vsel %vm971_vm3, %v966_v33, %v979_v43  ;;  %v4394_v33 = vld [vmem:[#allocation77_spill] sm:$0xff]  ;;  %v4400_v43 = vld [vmem:[#allocation83_spill] sm:$0xff] }
 0x393   : > { %v983_v7 = vmul.f32 1.050701, %v981_v57  ;;  %v4396_v57 = vld [vmem:[#allocation79_spill] sm:$0xff] }
 0x395   : > { %v1965_v45 = vpop.eup %1964 }
 0x396   : > { %v1900_v5 = vadd.f32 -1.0, %v1965_v45  ;;  %v4391_v45 = vld [vmem:[#allocation74_spill] sm:$0xff] }
 0x398   : > { %v980_v52 = vmul.f32 1.6732632, %v1900_v5  ;;  %v4392_v5 = vld [vmem:[#allocation75_spill] sm:$0xff] }
 0x39a   : > { %v982_v55 = vsel %vm972_vm4, %v969_v37, %v980_v52  ;;  %v4398_v37 = vld [vmem:[#allocation81_spill] sm:$0xff] }
 0x39b   : > { %v984_v53 = vmul.f32 1.050701, %v982_v55  ;;  %v4401_v52 = vld [vmem:[#allocation85_spill] sm:$0xff]  ;;  %v4402_v55 = vld [vmem:[#allocation88_spill] sm:$0xff] }
 0x39d   : > { %1901 = vmatpush.msk.msra.mxu3 %vm694_vm7, %v984_v53  ;;  %v4395_v53 = vld [vmem:[#allocation78_spill] sm:$0xff] }
 0x39f   : > { %1003 = vmatpush.msra.mxu3 %v983_v7  ;;  %v4403_v7 = vld [vmem:[#allocation91_spill] sm:$0xff] }
 0x3a0   : > { %1902 = vmatmul.msk.f32.vlgmr.msra.gmra.mxu3 %vm690_vm9, %v4387_v35 }
 0x3a1   : > { %1048 = vmatpush.msrb.mxu3 %v4388_v56  ;;  %v3366_v56 = vld [vmem:[%s4059_s3 + $0x3d8] sm:$0xff] }
 0x3a2   : > { %4404 = vst [vmem:[#allocation30_spill] sm:$0xff] %v3366_v56 }
 0x3a3   : > { %1049 = vmatpush.msrb.mxu3 %v4389_v60  ;;  %v3372_v60 = vld [vmem:[%s4059_s3 + $0x398] sm:$0xff] }
 0x3a4   : > { %4405 = vst [vmem:[#allocation48_spill] sm:$0xff] %v3372_v60 }
 0x3a5   : > { %1050 = vmatpush.msrb.mxu3 %v4390_v46  ;;  %v3378_v46 = vld [vmem:[%s4059_s3 + $0x358] sm:$0xff] }
 0x3a6   : > { %4406 = vst [vmem:[#allocation31_spill] sm:$0xff] %v3378_v46 }
 0x3a7   : > { %1051 = vmatpush.msrb.mxu3 %v4391_v45  ;;  %v3384_v45 = vld [vmem:[%s4059_s3 + $0x318] sm:$0xff] }
 0x3a8   : > { %4407 = vst [vmem:[#allocation32_spill] sm:$0xff] %v3384_v45 }
 0x3a9   : > { %1052 = vmatpush.msrb.mxu3 %v4392_v5  ;;  %v3390_v5 = vld [vmem:[%s4059_s3 + $0x2d8] sm:$0xff] }
 0x3aa   : > { %4408 = vst [vmem:[#allocation33_spill] sm:$0xff] %v3390_v5 }
 0x3ab   : > { %1053 = vmatpush.msrb.mxu3 %v4393_v16  ;;  %v4409_v16 = vld [vmem:[#allocation37_spill] sm:$0xff] }
 0x3ad   : > { %1054 = vmatpush.msrb.mxu3 %v4394_v33  ;;  %v4410_v33 = vld [vmem:[#allocation38_spill] sm:$0xff] }
 0x3af   : > { %1055 = vmatpush.msrb.mxu3 %v4395_v53  ;;  %v4411_v53 = vld [vmem:[#allocation39_spill] sm:$0xff] }
 0x3b1   : > { %1056 = vmatpush.msrb.mxu3 %v4396_v57  ;;  %v4412_v57 = vld [vmem:[#allocation40_spill] sm:$0xff] }
 0x3b3   : > { %1057 = vmatpush.msrb.mxu3 %v4397_v30  ;;  %v4413_v30 = vld [vmem:[#allocation41_spill] sm:$0xff] }
 0x3b5   : > { %1058 = vmatpush.msrb.mxu3 %v4398_v37  ;;  %v4414_v37 = vld [vmem:[#allocation42_spill] sm:$0xff] }
 0x3b7   : > { %1059 = vmatpush.msrb.mxu3 %v4399_v41  ;;  %v4415_v41 = vld [vmem:[#allocation43_spill] sm:$0xff] }
 0x3b9   : > { %1060 = vmatpush.msrb.mxu3 %v4400_v43  ;;  %v4416_v43 = vld [vmem:[#allocation44_spill] sm:$0xff] }
 0x3bb   : > { %1061 = vmatpush.msrb.mxu3 %v4401_v52  ;;  %v4417_v52 = vld [vmem:[#allocation45_spill] sm:$0xff] }
 0x3bd   : > { %1062 = vmatpush.msrb.mxu3 %v4402_v55  ;;  %v4418_v55 = vld [vmem:[#allocation46_spill] sm:$0xff] }
 0x3bf   : > { %1063 = vmatpush.msrb.mxu3 %v4403_v7  ;;  %v4419_v7 = vld [vmem:[#allocation47_spill] sm:$0xff] }
 0x3c1   : > { %1175 = vmatpush.msra.mxu3 %v3366_v56 }
 0x3c3   : > { %1176 = vmatpush.msra.mxu3 %v3372_v60 }
 0x3c5   : > { %1177 = vmatpush.msra.mxu3 %v3378_v46  ;;  %v4422_v46 = vld [vmem:[#allocation4_spill] sm:$0xff] }
 0x3c7   : > { %1178 = vmatpush.msra.mxu3 %v3384_v45 }
 0x3c9   : > { %1179 = vmatpush.msra.mxu3 %v3390_v5 }
 0x3cb   : > { %1180 = vmatpush.msra.mxu3 %v4409_v16  ;;  %v902_v16 = vpop.f32.mrf.mxu3 }
 0x3cd   : > { %1181 = vmatpush.msra.mxu3 %v4410_v33 }
 0x3cf   : > { %1182 = vmatpush.msra.mxu3 %v4411_v53 }
 0x3d1   : > { %1183 = vmatpush.msra.mxu3 %v4412_v57  ;;  %v4420_v57 = vld [vmem:[#allocation2_spill] sm:$0xff] }
 0x3d3   : > { %1184 = vmatpush.msra.mxu3 %v4413_v30  ;;  %v883_v30 = vadd.f32 %v3342_v28, %v4420_v57 }
 0x3d5   : > { %1185 = vmatpush.msra.mxu3 %v4414_v37  ;;  %v4421_v37 = vld [vmem:[#allocation3_spill] sm:$0xff] }
 0x3d7   : > { %1186 = vmatpush.msra.mxu3 %v4415_v41 }
 0x3d9   : > { %1187 = vmatpush.msra.mxu3 %v4416_v43 }
 0x3db   : > { %1188 = vmatpush.msra.mxu3 %v4417_v52  ;;  %v903_v52 = vadd.f32 %v902_v16, %v4422_v46 }
 0x3dd   : > { %1189 = vmatpush.msra.mxu3 %v4418_v55  ;;  %v4423_v55 = vld [vmem:[#allocation5_spill] sm:$0xff] }
 0x3df   : > { %1190 = vmatpush.msra.mxu3 %v4419_v7 }
 0x423   : > { %v1005_v33 = vpop.f32.mrf.mxu3 }
 0x424   : > { %1024 = vmatmul.f32.vlgmr.msrb.gmra.mxu1 %v1005_v33  ;;  %1044 = vmatmul.f32.vlgmr.msrb.gmra.mxu2 %v1005_v33 }
 0x425   : > { %1064 = vmatmul.f32.vlgmr.msrb.gmra.mxu3 %v1005_v33 }
 0x4a1   : > { %v1025_v53 = vpop.f32.mrf.mxu1 }
 0x4a2   : > { %v1026_v5 = vadd.f32 %v1025_v53, %v4421_v37 }
 0x4a4   : > { %v1068_v41 = vadd.f32 %v1026_v5, %v883_v30 }
 0x4a6   : > { %v1903_v45 = vmul.f32 -1.442695, %v1068_v41 }
 0x4a7   : > { %v1045_v43 = vpop.f32.mrf.mxu2 }
 0x4a8   : > { %1966 = vpow2.f32 %v1903_v45  ;;  %v1046_v60 = vadd.f32 %v1045_v43, %v4423_v55  ;;  %v922_v45 = vpop.f32.mrf.mxu0  ;;  %v1065_v43 = vpop.f32.mrf.mxu3 }
 0x4aa   : > { %v1088_v7 = vadd.f32 %v1046_v60, %v903_v52 }
 0x4ac   : > { %v1904_v56 = vmul.f32 -1.442695, %v1088_v7 }
 0x4ae   : > { %v1967_v35 = vpop.eup %1966  ;;  %1968 = vpow2.f32 %v1904_v56 }
 0x4af   : > { %v1072_v31 = vadd.f32 1.0, %v1967_v35  ;;  %v923_v35 = vadd.f32 %v922_v45, %v3127_v50 }
 0x4b1   : > { %1970 = vrcp.f32 %v1072_v31  ;;  %v1084_v5 = vand.u32 2147483648, %v1072_v31  ;;  %v1082_v41 = vand.u32 2147483647, %v1072_v31  ;;  %vm1078_vm6 = vweird.f32 %v1072_v31 }
 0x4b3   : > { %v1085_v56 = vor.u32 1.1754944e-38, %v1084_v5  ;;  %vm1083_vm10 = vcmp.eq.f32.partialorder %v1082_v41, 8.507059e+37 }
 0x4b4   : > { %v1969_v33 = vpop.eup %1968 }
 0x4b5   : > { %v1092_v11 = vadd.f32 1.0, %v1969_v33  ;;  %v1066_v33 = vadd.f32 %v1065_v43, %v3129_v44 }
 0x4b7   : > { %v1971_v3 = vpop.eup %1970  ;;  %1972 = vrcp.f32 %v1092_v11  ;;  %v1102_v57 = vand.u32 2147483647, %v1092_v11  ;;  %vm1098_vm12 = vweird.f32 %v1092_v11 }
 0x4b8   : > { %v1074_v28 = vmul.f32 %v1971_v3, %v1072_v31  ;;  %vm1079_vm5 = vweird.f32 %v1971_v3 }
 0x4b9   : > { %vm1080_vm8 = vmor %vm1078_vm6, %vm1079_vm5  ;;  %vm1103_vm14 = vcmp.eq.f32.partialorder %v1102_v57, 8.507059e+37  ;;  %v2036_v57 = vld [vmem:[%s4059_s3 + $0x2c0] sm:$0xff] }
 0x4ba   : > { %v1075_v53 = vsub.f32 1.0, %v1074_v28 }
 0x4bc   : > { %v1076_v30 = vmul.f32 %v1971_v3, %v1075_v53  ;;  %v1104_v53 = vand.u32 2147483648, %v1092_v11 }
 0x4bd   : > { %v1973_v16 = vpop.eup %1972 }
 0x4be   : > { %v1094_v46 = vmul.f32 %v1973_v16, %v1092_v11  ;;  %v1077_v60 = vadd.f32 %v1971_v3, %v1076_v30  ;;  %vm1099_vm11 = vweird.f32 %v1973_v16  ;;  %v1105_v30 = vor.u32 1.1754944e-38, %v1104_v53  ;;  %v2035_v11 = vld [vmem:[%s4059_s3 + $0x300] sm:$0xff] }
 0x4bf   : > { %vm1100_vm13 = vmor %vm1098_vm12, %vm1099_vm11  ;;  %v2047_v53 = vld [vmem:[%s4059_s3] sm:$0xff] }
 0x4c0   : > { %v1095_v52 = vsub.f32 1.0, %v1094_v46  ;;  %v1081_v7 = vsel %vm1080_vm8, %v1971_v3, %v1077_v60  ;;  %v2040_v60 = vld [vmem:[%s4059_s3 + $0x1c0] sm:$0xff] }
 0x4c1   : > { %v1086_v28 = vsel %vm1083_vm10, %v1085_v56, %v1081_v7  ;;  %v2041_v56 = vld [vmem:[%s4059_s3 + $0x180] sm:$0xff] }
 0x4c2   : > { %v1096_v55 = vmul.f32 %v1973_v16, %v1095_v52  ;;  %v1108_v37 = vmul.f32 %v1086_v28, %v923_v35  ;;  %v2042_v35 = vld [vmem:[%s4059_s3 + $0x140] sm:$0xff] }
 0x4c3   : > { %v2043_v52 = vld [vmem:[%s4059_s3 + $0x100] sm:$0xff] }
 0x4c4   : > { %v1097_v54 = vadd.f32 %v1973_v16, %v1096_v55  ;;  %v1109_v51 = vadd.f32 %v1108_v37, %v1066_v33  ;;  %v2037_v37 = vld [vmem:[%s4059_s3 + $0x280] sm:$0xff] }
 0x4c5   : > { %v2038_v55 = vld [vmem:[%s4059_s3 + $0x240] sm:$0xff] }
 0x4c6   : > { %v1101_v31 = vsel %vm1100_vm13, %v1973_v16, %v1097_v54  ;;  %1974 = vtanh.f32 %v1109_v51  ;;  %v2032_v51 = vld [vmem:[%s4059_s3 + $0x3c0] sm:$0xff] }
 0x4c7   : > { %v1106_v5 = vsel %vm1103_vm14, %v1105_v30, %v1101_v31  ;;  %v2033_v54 = vld [vmem:[%s4059_s3 + $0x380] sm:$0xff]  ;;  %v3568_v31 = vld [vmem:[%s4059_s3 + $0x268] sm:$0xff]  ;;  %v3574_v30 = vld [vmem:[%s4059_s3 + $0x270] sm:$0xff] }
 0x4c8   : > { %v1111_v46 = vsub.f32 1.0, %v1106_v5  ;;  %v1113_v45 = vmul.f32 %v1106_v5, %v3134_v49  ;;  %v2034_v49 = vld [vmem:[%s4059_s3 + $0x340] sm:$0xff]  ;;  %v3580_v5 = vld [vmem:[%s4059_s3 + $0x228] sm:$0xff] }
 0x4c9   : > { %v2039_v16 = vld [vmem:[%s4059_s3 + $0x200] sm:$0xff] }
 0x4ca   : > { %v2044_v7 = vld [vmem:[%s4059_s3 + $0xc0] sm:$0xff] }
 0x4cb   : > { %v2045_v33 = vld [vmem:[%s4059_s3 + $0x80] sm:$0xff] }
 0x4cc   : > { %v1975_v3 = vpop.eup %1974  ;;  %v2046_v28 = vld [vmem:[%s4059_s3 + $0x40] sm:$0xff] }
 0x4cd   : > { %v1112_v41 = vmul.f32 %v1975_v3, %v1111_v46  ;;  %v3586_v46 = vld [vmem:[%s4059_s3 + $0x230] sm:$0xff]  ;;  %v3592_v3 = vld [vmem:[%s4059_s3 + $0x1e8] sm:$0xff] }
 0x4cf   : > { %v3412_v43 = vadd.f32 %v1113_v45, %v1112_v41  ;;  %v3598_v41 = vld [vmem:[%s4059_s3 + $0x1f0] sm:$0xff]  ;;  %v3604_v45 = vld [vmem:[%s4059_s3 + $0x1a8] sm:$0xff] }
 0x4d1   : > { %1131 = vmatmul.f32.vlgmr.msra.gmra.mxu0 %v3412_v43  ;;  %1151 = vmatmul.f32.vlgmr.msra.gmra.mxu1 %v3412_v43 }
 0x4d2   : > { %1171 = vmatmul.f32.vlgmr.msra.gmra.mxu2 %v3412_v43  ;;  %1191 = vmatmul.f32.vlgmr.msra.gmra.mxu3 %v3412_v43 }
 0x4d3   : > { %1405 = vmatpush.msra.mxu0 %v2032_v51  ;;  %v3610_v51 = vld [vmem:[%s4059_s3 + $0x1b0] sm:$0xff] }
 0x4d5   : > { %1406 = vmatpush.msra.mxu0 %v2033_v54  ;;  %v3616_v54 = vld [vmem:[%s4059_s3 + $0x168] sm:$0xff] }
 0x4d7   : > { %1407 = vmatpush.msra.mxu0 %v2034_v49  ;;  %v3622_v49 = vld [vmem:[%s4059_s3 + $0x170] sm:$0xff] }
 0x4d8   : > { %4424 = vst [vmem:[#allocation34_spill] sm:$0xff] %v3622_v49 }
 0x4d9   : > { %1211 = vmatmul.f32.vlgmr.msrb.gmra.mxu0 %v3412_v43 }
 0x4da   : > { %1408 = vmatpush.msra.mxu0 %v2035_v11  ;;  %v3628_v11 = vld [vmem:[%s4059_s3 + $0x128] sm:$0xff] }
 0x4dc   : > { %1409 = vmatpush.msra.mxu0 %v2036_v57  ;;  %v3634_v57 = vld [vmem:[%s4059_s3 + $0x130] sm:$0xff] }
 0x4dd   : > { %4425 = vst [vmem:[#allocation49_spill] sm:$0xff] %v3634_v57 }
 0x4de   : > { %1410 = vmatpush.msra.mxu0 %v2037_v37  ;;  %v4434_v37 = vld [vmem:[#allocation15_spill] sm:$0xff] }
 0x4e0   : > { %1411 = vmatpush.msra.mxu0 %v2038_v55  ;;  %v2080_v55 = vld [vmem:[%s4059_s3 + $0xd0] sm:$0xff] }
 0x4e2   : > { %1412 = vmatpush.msra.mxu0 %v2039_v16  ;;  %v4435_v16 = vld [vmem:[#allocation17_spill] sm:$0xff] }
 0x4e4   : > { %1413 = vmatpush.msra.mxu0 %v2040_v60  ;;  %v2081_v60 = vld [vmem:[%s4059_s3 + $0x90] sm:$0xff] }
 0x4e6   : > { %1414 = vmatpush.msra.mxu0 %v2041_v56  ;;  %v4436_v56 = vld [vmem:[#allocation19_spill] sm:$0xff] }
 0x4e8   : > { %1415 = vmatpush.msra.mxu0 %v2042_v35  ;;  %v2082_v35 = vld [vmem:[%s4059_s3 + $0x50] sm:$0xff] }
 0x4ea   : > { %1416 = vmatpush.msra.mxu0 %v2043_v52  ;;  %v2083_v52 = vld [vmem:[%s4059_s3 + $0x8] sm:$0xff] }
 0x4ec   : > { %1417 = vmatpush.msra.mxu0 %v2044_v7  ;;  %v2084_v7 = vld [vmem:[%s4059_s3 + $0x10] sm:$0xff] }
 0x4ee   : > { %1418 = vmatpush.msra.mxu0 %v2045_v33 }
 0x4f0   : > { %1419 = vmatpush.msra.mxu0 %v2046_v28 }
 0x4f2   : > { %1420 = vmatpush.msra.mxu0 %v2047_v53 }
 0x4f4   : > { %1485 = vmatpush.msrb.mxu0 %v2902_v1 }
 0x4f6   : > { %1486 = vmatpush.msrb.mxu0 %v2938_v21 }
 0x4f8   : > { %1487 = vmatpush.msrb.mxu0 %v2943_v26 }
 0x4fa   : > { %1488 = vmatpush.msrb.mxu0 %v2952_v2 }
 0x4fc   : > { %1489 = vmatpush.msrb.mxu0 %v2961_v17  ;;  %v3492_v17 = vld [vmem:[%s4059_s3 + $0x3e8] sm:$0xff] }
 0x4fe   : > { %1490 = vmatpush.msrb.mxu0 %v2970_v4  ;;  %v3498_v4 = vld [vmem:[%s4059_s3 + $0x3f0] sm:$0xff] }
 0x500   : > { %1491 = vmatpush.msrb.mxu0 %v2979_v6  ;;  %v3504_v6 = vld [vmem:[%s4059_s3 + $0x3a8] sm:$0xff] }
 0x502   : > { %1492 = vmatpush.msrb.mxu0 %v2988_v8  ;;  %v3510_v8 = vld [vmem:[%s4059_s3 + $0x3b0] sm:$0xff] }
 0x504   : > { %1493 = vmatpush.msrb.mxu0 %v2997_v10  ;;  %v3516_v10 = vld [vmem:[%s4059_s3 + $0x368] sm:$0xff] }
 0x506   : > { %1494 = vmatpush.msrb.mxu0 %v3006_v12  ;;  %v3522_v12 = vld [vmem:[%s4059_s3 + $0x370] sm:$0xff] }
 0x508   : > { %1495 = vmatpush.msrb.mxu0 %v3015_v14  ;;  %v3528_v14 = vld [vmem:[%s4059_s3 + $0x328] sm:$0xff] }
 0x50a   : > { %1496 = vmatpush.msrb.mxu0 %v3024_v19  ;;  %v3534_v19 = vld [vmem:[%s4059_s3 + $0x330] sm:$0xff] }
 0x50c   : > { %1497 = vmatpush.msrb.mxu0 %v3035_v22  ;;  %v3544_v22 = vld [vmem:[%s4059_s3 + $0x2e8] sm:$0xff] }
 0x50e   : > { %1498 = vmatpush.msrb.mxu0 %v3044_v23  ;;  %v3550_v23 = vld [vmem:[%s4059_s3 + $0x2f0] sm:$0xff] }
 0x510   : > { %1499 = vmatpush.msrb.mxu0 %v3053_v25  ;;  %v3556_v25 = vld [vmem:[%s4059_s3 + $0x2a8] sm:$0xff] }
 0x512   : > { %1500 = vmatpush.msrb.mxu0 %v3062_v27  ;;  %v3562_v27 = vld [vmem:[%s4059_s3 + $0x2b0] sm:$0xff] }
 0x54e   : > { %v1132_v26 = vpop.f32.mrf.mxu0  ;;  %v1152_v1 = vpop.f32.mrf.mxu1 }
 0x54f   : > { %v1133_v21 = vadd.f32 %v1132_v26, %v4331_v42  ;;  %v1153_v2 = vadd.f32 %v1152_v1, %v4332_v58 }
 0x551   : > { %1230 = vmatpush.msrb.mxu1 %v1153_v2  ;;  %1253 = vmatpush.msrb.mxu2 %v1133_v21 }
 0x552   : > { %1905 = vmatmul.msk.f32.vlgmr.msrb.gmra.mxu1 %vm617_vm2, %v4333_v62  ;;  %1907 = vmatmul.msk.f32.vlgmr.msrb.gmra.mxu2 %vm617_vm2, %v4334_v59 }
 0x553   : > { %1298 = vmatpush.msra.mxu1 %v3492_v17  ;;  %1318 = vmatpush.msra.mxu2 %v3498_v4 }
 0x555   : > { %1299 = vmatpush.msra.mxu1 %v3504_v6  ;;  %1319 = vmatpush.msra.mxu2 %v3510_v8  ;;  %v3703_v33 = vpop.f32.mrf.mxu2 }
 0x557   : > { %1300 = vmatpush.msra.mxu1 %v3516_v10  ;;  %1320 = vmatpush.msra.mxu2 %v3522_v12 }
 0x559   : > { %1301 = vmatpush.msra.mxu1 %v3528_v14  ;;  %1321 = vmatpush.msra.mxu2 %v3534_v19 }
 0x55a   : > { %1906 = vmatmul.msk.f32.gmra.mxu1 %vm617_vm2, %v4343_v36  ;;  %1908 = vmatmul.msk.f32.gmra.mxu2 %vm617_vm2, %v4344_v39 }
 0x55b   : > { %1302 = vmatpush.msra.mxu1 %v3544_v22  ;;  %1322 = vmatpush.msra.mxu2 %v3550_v23 }
 0x55d   : > { %1303 = vmatpush.msra.mxu1 %v3556_v25  ;;  %1323 = vmatpush.msra.mxu2 %v3562_v27 }
 0x55f   : > { %1304 = vmatpush.msra.mxu1 %v3568_v31  ;;  %1324 = vmatpush.msra.mxu2 %v3574_v30 }
 0x561   : > { %1305 = vmatpush.msra.mxu1 %v3580_v5  ;;  %1325 = vmatpush.msra.mxu2 %v3586_v46 }
 0x563   : > { %1306 = vmatpush.msra.mxu1 %v3592_v3  ;;  %1326 = vmatpush.msra.mxu2 %v3598_v41 }
 0x565   : > { %1307 = vmatpush.msra.mxu1 %v3604_v45  ;;  %1327 = vmatpush.msra.mxu2 %v3610_v51 }
 0x567   : > { %1308 = vmatpush.msra.mxu1 %v3616_v54  ;;  %1328 = vmatpush.msra.mxu2 %v3622_v49 }
 0x569   : > { %1309 = vmatpush.msra.mxu1 %v3628_v11  ;;  %1329 = vmatpush.msra.mxu2 %v3634_v57 }
 0x56b   : > { %1310 = vmatpush.msra.mxu1 %v2858_v15  ;;  %1330 = vmatpush.msra.mxu2 %v2863_v18  ;;  %v2072_v18 = vld [vmem:[%s4059_s3 + $0x2d0] sm:$0xff]  ;;  %v4427_v15 = vld [vmem:[#allocation7_spill] sm:$0xff] }
 0x56d   : > { %1311 = vmatpush.msra.mxu1 %v2874_v13  ;;  %1331 = vmatpush.msra.mxu2 %v4358_v29  ;;  %v4426_v13 = vld [vmem:[#allocation6_spill] sm:$0xff]  ;;  %v2073_v29 = vld [vmem:[%s4059_s3 + $0x290] sm:$0xff] }
 0x56f   : > { %1312 = vmatpush.msra.mxu1 %v4359_v34  ;;  %1332 = vmatpush.msra.mxu2 %v4360_v48  ;;  %v4428_v34 = vld [vmem:[#allocation8_spill] sm:$0xff] }
 0x570   : > { %v2074_v48 = vld [vmem:[%s4059_s3 + $0x250] sm:$0xff] }
 0x571   : > { %1313 = vmatpush.msra.mxu1 %v4361_v9  ;;  %1333 = vmatpush.msra.mxu2 %v4362_v32  ;;  %v4429_v9 = vld [vmem:[#allocation9_spill] sm:$0xff]  ;;  %v2075_v32 = vld [vmem:[%s4059_s3 + $0x210] sm:$0xff] }
 0x573   : > { %1425 = vmatpush.msrb.mxu1 %v3218_v24  ;;  %1445 = vmatpush.msrb.mxu2 %v3224_v63  ;;  %v4430_v24 = vld [vmem:[#allocation10_spill] sm:$0xff]  ;;  %v2076_v63 = vld [vmem:[%s4059_s3 + $0x1d0] sm:$0xff] }
 0x575   : > { %1426 = vmatpush.msrb.mxu1 %v3230_v20  ;;  %1446 = vmatpush.msrb.mxu2 %v3236_v61  ;;  %v4431_v20 = vld [vmem:[#allocation11_spill] sm:$0xff]  ;;  %v2077_v61 = vld [vmem:[%s4059_s3 + $0x190] sm:$0xff] }
 0x577   : > { %1427 = vmatpush.msrb.mxu1 %v3242_v47  ;;  %1447 = vmatpush.msrb.mxu2 %v3248_v40  ;;  %v4432_v47 = vld [vmem:[#allocation12_spill] sm:$0xff] }
 0x578   : > { %v2078_v40 = vld [vmem:[%s4059_s3 + $0x150] sm:$0xff] }
 0x579   : > { %1428 = vmatpush.msrb.mxu1 %v3254_v0  ;;  %1448 = vmatpush.msrb.mxu2 %v3260_v38  ;;  %v4433_v0 = vld [vmem:[#allocation13_spill] sm:$0xff]  ;;  %v2079_v38 = vld [vmem:[%s4059_s3 + $0x110] sm:$0xff] }
 0x57b   : > { %1429 = vmatpush.msrb.mxu1 %v4426_v13  ;;  %1449 = vmatpush.msrb.mxu2 %v2072_v18 }
 0x57d   : > { %1430 = vmatpush.msrb.mxu1 %v4427_v15  ;;  %1450 = vmatpush.msrb.mxu2 %v2073_v29 }
 0x57f   : > { %1431 = vmatpush.msrb.mxu1 %v4428_v34  ;;  %1451 = vmatpush.msrb.mxu2 %v2074_v48 }
 0x581   : > { %1432 = vmatpush.msrb.mxu1 %v4429_v9  ;;  %1452 = vmatpush.msrb.mxu2 %v2075_v32 }
 0x583   : > { %1433 = vmatpush.msrb.mxu1 %v4430_v24  ;;  %1453 = vmatpush.msrb.mxu2 %v2076_v63 }
 0x585   : > { %1434 = vmatpush.msrb.mxu1 %v4431_v20  ;;  %1454 = vmatpush.msrb.mxu2 %v2077_v61 }
 0x587   : > { %1435 = vmatpush.msrb.mxu1 %v4432_v47  ;;  %1455 = vmatpush.msrb.mxu2 %v2078_v40  ;;  %v4437_v47 = vld [vmem:[#allocation70_spill] sm:$0xff]  ;;  %v3711_v40 = vld [vmem:[%s4059_s3 + $0x3f8] sm:$0xff] }
 0x589   : > { %1436 = vmatpush.msrb.mxu1 %v4433_v0  ;;  %1456 = vmatpush.msrb.mxu2 %v2079_v38  ;;  %v3717_v0 = vld [vmem:[%s4059_s3 + $0x3b8] sm:$0xff] }
 0x58a   : > { %v3723_v38 = vld [vmem:[%s4059_s3 + $0x378] sm:$0xff] }
 0x58b   : > { %1437 = vmatpush.msrb.mxu1 %v4434_v37  ;;  %1457 = vmatpush.msrb.mxu2 %v2080_v55  ;;  %v3729_v37 = vld [vmem:[%s4059_s3 + $0x338] sm:$0xff] }
 0x58c   : > { %v3735_v55 = vld [vmem:[%s4059_s3 + $0x2f8] sm:$0xff] }
 0x58d   : > { %1438 = vmatpush.msrb.mxu1 %v4435_v16  ;;  %1458 = vmatpush.msrb.mxu2 %v2081_v60  ;;  %v3741_v16 = vld [vmem:[%s4059_s3 + $0x2b8] sm:$0xff] }
 0x58e   : > { %v3747_v60 = vld [vmem:[%s4059_s3 + $0x278] sm:$0xff] }
 0x58f   : > { %1439 = vmatpush.msrb.mxu1 %v4436_v56  ;;  %1459 = vmatpush.msrb.mxu2 %v2082_v35  ;;  %v3753_v56 = vld [vmem:[%s4059_s3 + $0x238] sm:$0xff] }
 0x590   : > { %v3759_v35 = vld [vmem:[%s4059_s3 + $0x1f8] sm:$0xff] }
 0x591   : > { %1440 = vmatpush.msrb.mxu1 %v2083_v52  ;;  %1460 = vmatpush.msrb.mxu2 %v2084_v7  ;;  %v3765_v52 = vld [vmem:[%s4059_s3 + $0x1b8] sm:$0xff] }
 0x592   : > { %v3771_v7 = vld [vmem:[%s4059_s3 + $0x178] sm:$0xff] }
 0x593   : > { %4438 = vst [vmem:[#allocation50_spill] sm:$0xff] %v3771_v7 }
 0x5cf   : > { %v1232_v28 = vpop.f32.mrf.mxu1 }
 0x5d5   : > { %v1255_v53 = vpop.f32.mrf.mxu2 }
 0x5d6   : > { %v1256_v26 = vadd.f32 %v1255_v53, %v1232_v28  ;;  %v3777_v28 = vld [vmem:[%s4059_s3 + $0x138] sm:$0xff] }
 0x5d7   : > { %v1235_v21 = vpop.f32.mrf.mxu1  ;;  %4439 = vst [vmem:[#allocation51_spill] sm:$0xff] %v3777_v28  ;;  %v3783_v53 = vld [vmem:[%s4059_s3 + $0xf8] sm:$0xff] }
 0x5d8   : > { %v1263_v1 = vmul.f32 1.442695, %v1256_v26  ;;  %vm1261_vm15 = vcmp.gt.f32.partialorder %v1256_v26, 0.0  ;;  %4440 = vst [vmem:[#allocation52_spill] sm:$0xff] %v3783_v53 }
 0x5da   : > { %1976 = vpow2.f32 %v1263_v1  ;;  %v3795_v1 = vld [vmem:[%s4059_s3 + $0x78] sm:$0xff] }
 0x5db   : > { %4442 = vst [vmem:[#allocation54_spill] sm:$0xff] %v3795_v1 }
 0x5dd   : > { %v1258_v2 = vpop.f32.mrf.mxu2 }
 0x5de   : > { %v1259_v13 = vadd.f32 %v1258_v2, %v1235_v21  ;;  %v3801_v21 = vld [vmem:[%s4059_s3 + $0x38] sm:$0xff]  ;;  %v4444_v2 = vld [vmem:[#allocation30_spill] sm:$0xff] }
 0x5df   : > { %4443 = vst [vmem:[#allocation55_spill] sm:$0xff] %v3801_v21 }
 0x5e0   : > { %v1265_v18 = vmul.f32 1.442695, %v1259_v13  ;;  %v1977_v15 = vpop.eup %1976  ;;  %vm1262_vm0 = vcmp.gt.f32.partialorder %v1259_v13, 0.0 }
 0x5e1   : > { %v1909_v29 = vadd.f32 -1.0, %v1977_v15  ;;  %v4447_v15 = vld [vmem:[#allocation32_spill] sm:$0xff] }
 0x5e2   : > { %1978 = vpow2.f32 %v1265_v18  ;;  %v4446_v18 = vld [vmem:[#allocation31_spill] sm:$0xff] }
 0x5e3   : > { %v1269_v48 = vmul.f32 1.6732632, %v1909_v29  ;;  %v4448_v29 = vld [vmem:[#allocation33_spill] sm:$0xff] }
 0x5e5   : > { %v1271_v63 = vsel %vm1261_vm15, %v1256_v26, %v1269_v48  ;;  %v3789_v26 = vld [vmem:[%s4059_s3 + $0xb8] sm:$0xff] }
 0x5e6   : > { %v1273_v61 = vmul.f32 1.050701, %v1271_v63  ;;  %4441 = vst [vmem:[#allocation53_spill] sm:$0xff] %v3789_v26  ;;  %v2102_v48 = vld [vmem:[%s4059_s3 + $0x258] sm:$0xff] }
 0x5e7   : > { %v2106_v63 = vld [vmem:[%s4059_s3 + $0x158] sm:$0xff] }
 0x5e8   : > { %v1979_v34 = vpop.eup %1978 }
 0x5e9   : > { %v1910_v9 = vadd.f32 -1.0, %v1979_v34  ;;  %v2101_v34 = vld [vmem:[%s4059_s3 + $0x298] sm:$0xff] }
 0x5eb   : > { %v1270_v32 = vmul.f32 1.6732632, %v1910_v9  ;;  %v2103_v9 = vld [vmem:[%s4059_s3 + $0x218] sm:$0xff] }
 0x5ed   : > { %v1272_v24 = vsel %vm1262_vm0, %v1259_v13, %v1270_v32  ;;  %v4445_v13 = vld [vmem:[#allocation48_spill] sm:$0xff]  ;;  %v2104_v32 = vld [vmem:[%s4059_s3 + $0x1d8] sm:$0xff] }
 0x5ee   : > { %v1274_v20 = vmul.f32 1.050701, %v1272_v24  ;;  %v2105_v24 = vld [vmem:[%s4059_s3 + $0x198] sm:$0xff] }
 0x5f0   : > { %1911 = vmatpush.msk.msrb.mxu3 %vm694_vm7, %v1274_v20  ;;  %v2107_v20 = vld [vmem:[%s4059_s3 + $0x118] sm:$0xff] }
 0x5f2   : > { %1293 = vmatpush.msrb.mxu3 %v1273_v61  ;;  %v2108_v61 = vld [vmem:[%s4059_s3 + $0xd8] sm:$0xff] }
 0x5f3   : > { %1912 = vmatmul.msk.f32.vlgmr.msrb.gmra.mxu3 %vm690_vm9, %v4437_v47  ;;  %v4452_v47 = vld [vmem:[#allocation5_spill] sm:$0xff] }
 0x5f4   : > { %1338 = vmatpush.msra.mxu3 %v3711_v40 }
 0x5f6   : > { %1339 = vmatpush.msra.mxu3 %v3717_v0 }
 0x5f8   : > { %1340 = vmatpush.msra.mxu3 %v3723_v38 }
 0x5fa   : > { %1341 = vmatpush.msra.mxu3 %v3729_v37 }
 0x5fc   : > { %1342 = vmatpush.msra.mxu3 %v3735_v55 }
 0x5fe   : > { %1343 = vmatpush.msra.mxu3 %v3741_v16 }
 0x600   : > { %1344 = vmatpush.msra.mxu3 %v3747_v60 }
 0x602   : > { %1345 = vmatpush.msra.mxu3 %v3753_v56 }
 0x604   : > { %1346 = vmatpush.msra.mxu3 %v3759_v35 }
 0x606   : > { %1347 = vmatpush.msra.mxu3 %v3765_v52 }
 0x608   : > { %1348 = vmatpush.msra.mxu3 %v3771_v7 }
 0x60a   : > { %1349 = vmatpush.msra.mxu3 %v3777_v28 }
 0x60c   : > { %1350 = vmatpush.msra.mxu3 %v3783_v53 }
 0x60e   : > { %1351 = vmatpush.msra.mxu3 %v3789_v26 }
 0x610   : > { %1352 = vmatpush.msra.mxu3 %v3795_v1 }
 0x612   : > { %1353 = vmatpush.msra.mxu3 %v3801_v21 }
 0x614   : > { %1465 = vmatpush.msrb.mxu3 %v4444_v2  ;;  %v2109_v2 = vld [vmem:[%s4059_s3 + $0x98] sm:$0xff] }
 0x616   : > { %1466 = vmatpush.msrb.mxu3 %v4445_v13  ;;  %v2110_v13 = vld [vmem:[%s4059_s3 + $0x58] sm:$0xff] }
 0x618   : > { %1467 = vmatpush.msrb.mxu3 %v4446_v18  ;;  %v2111_v18 = vld [vmem:[%s4059_s3 + $0x18] sm:$0xff] }
 0x61a   : > { %1468 = vmatpush.msrb.mxu3 %v4447_v15  ;;  %v1192_v15 = vpop.f32.mrf.mxu3 }
 0x61c   : > { %1469 = vmatpush.msrb.mxu3 %v4448_v29 }
 0x61e   : > { %1470 = vmatpush.msrb.mxu3 %v2101_v34 }
 0x620   : > { %1471 = vmatpush.msrb.mxu3 %v2102_v48  ;;  %v4449_v48 = vld [vmem:[#allocation2_spill] sm:$0xff] }
 0x622   : > { %1472 = vmatpush.msrb.mxu3 %v2103_v9  ;;  %v1173_v9 = vadd.f32 %v3703_v33, %v4449_v48 }
 0x624   : > { %1473 = vmatpush.msrb.mxu3 %v2104_v32  ;;  %v4450_v32 = vld [vmem:[#allocation3_spill] sm:$0xff] }
 0x626   : > { %1474 = vmatpush.msrb.mxu3 %v2105_v24 }
 0x628   : > { %1475 = vmatpush.msrb.mxu3 %v2106_v63 }
 0x62a   : > { %1476 = vmatpush.msrb.mxu3 %v2107_v20 }
 0x62c   : > { %1477 = vmatpush.msrb.mxu3 %v2108_v61 }
 0x62e   : > { %1478 = vmatpush.msrb.mxu3 %v2109_v2  ;;  %v4451_v2 = vld [vmem:[#allocation4_spill] sm:$0xff] }
 0x630   : > { %1479 = vmatpush.msrb.mxu3 %v2110_v13  ;;  %v1193_v13 = vadd.f32 %v1192_v15, %v4451_v2 }
 0x632   : > { %1480 = vmatpush.msrb.mxu3 %v2111_v18 }
 0x676   : > { %v1295_v29 = vpop.f32.mrf.mxu3 }
 0x677   : > { %1314 = vmatmul.f32.vlgmr.msra.gmra.mxu1 %v1295_v29  ;;  %1334 = vmatmul.f32.vlgmr.msra.gmra.mxu2 %v1295_v29 }
 0x678   : > { %1354 = vmatmul.f32.vlgmr.msra.gmra.mxu3 %v1295_v29 }
 0x6f4   : > { %v1315_v34 = vpop.f32.mrf.mxu1 }
 0x6f5   : > { %v1316_v24 = vadd.f32 %v1315_v34, %v4450_v32 }
 0x6f7   : > { %v1358_v63 = vadd.f32 %v1316_v24, %v1173_v9 }
 0x6f9   : > { %v1913_v20 = vmul.f32 -1.442695, %v1358_v63 }
 0x6fa   : > { %v1335_v61 = vpop.f32.mrf.mxu2 }
 0x6fb   : > { %1980 = vpow2.f32 %v1913_v20  ;;  %v1336_v21 = vadd.f32 %v1335_v61, %v4452_v47  ;;  %v1212_v20 = vpop.f32.mrf.mxu0  ;;  %v1355_v61 = vpop.f32.mrf.mxu3 }
 0x6fd   : > { %v1378_v18 = vadd.f32 %v1336_v21, %v1193_v13 }
 0x6ff   : > { %v1914_v1 = vmul.f32 -1.442695, %v1378_v18 }
 0x701   : > { %v1981_v26 = vpop.eup %1980  ;;  %1982 = vpow2.f32 %v1914_v1 }
 0x702   : > { %v1362_v53 = vadd.f32 1.0, %v1981_v26  ;;  %v1213_v26 = vadd.f32 %v1212_v20, %v3127_v50 }
 0x704   : > { %1984 = vrcp.f32 %v1362_v53  ;;  %v1374_v9 = vand.u32 2147483648, %v1362_v53  ;;  %v1372_v63 = vand.u32 2147483647, %v1362_v53  ;;  %vm1368_vm3 = vweird.f32 %v1362_v53 }
 0x706   : > { %v1375_v1 = vor.u32 1.1754944e-38, %v1374_v9  ;;  %vm1373_vm5 = vcmp.eq.f32.partialorder %v1372_v63, 8.507059e+37 }
 0x707   : > { %v1983_v29 = vpop.eup %1982 }
 0x708   : > { %v1382_v28 = vadd.f32 1.0, %v1983_v29  ;;  %v1356_v29 = vadd.f32 %v1355_v61, %v3129_v44 }
 0x70a   : > { %v1985_v57 = vpop.eup %1984  ;;  %1986 = vrcp.f32 %v1382_v28  ;;  %v1392_v48 = vand.u32 2147483647, %v1382_v28  ;;  %vm1388_vm8 = vweird.f32 %v1382_v28 }
 0x70b   : > { %v1364_v33 = vmul.f32 %v1985_v57, %v1362_v53  ;;  %vm1369_vm1 = vweird.f32 %v1985_v57 }
 0x70c   : > { %vm1370_vm4 = vmor %vm1368_vm3, %vm1369_vm1  ;;  %vm1393_vm11 = vcmp.eq.f32.partialorder %v1392_v48, 8.507059e+37  ;;  %v1709_v48 = vld [vmem:[%s4061_s5 + $0x70] sm:$0xff] }
 0x70d   : > { %v1365_v34 = vsub.f32 1.0, %v1364_v33 }
 0x70f   : > { %v1366_v24 = vmul.f32 %v1985_v57, %v1365_v34  ;;  %v1394_v34 = vand.u32 2147483648, %v1382_v28 }
 0x710   : > { %v1987_v15 = vpop.eup %1986 }
 0x711   : > { %v1384_v32 = vmul.f32 %v1987_v15, %v1382_v28  ;;  %v1367_v21 = vadd.f32 %v1985_v57, %v1366_v24  ;;  %vm1389_vm6 = vweird.f32 %v1987_v15  ;;  %v1395_v24 = vor.u32 1.1754944e-38, %v1394_v34  ;;  %v1710_v28 = vld [vmem:[%s4061_s5 + $0x78] sm:$0xff]  ;;  %v4462_v34 = vld [vmem:[#allocation2_spill] sm:$0xff] }
 0x712   : > { %vm1390_vm10 = vmor %vm1388_vm8, %vm1389_vm6  ;;  %vm1793_vm6 = vcmask 1040384  }
 0x713   : > { %v1385_v13 = vsub.f32 1.0, %v1384_v32  ;;  %v1371_v18 = vsel %vm1370_vm4, %v1985_v57, %v1367_v21 }
 0x714   : > { %v1376_v33 = vsel %vm1373_vm5, %v1375_v1, %v1371_v18  ;;  %v1706_v1 = vld [vmem:[%s4061_s5 + $0x58] sm:$0xff]  ;;  %v1703_v18 = vld [vmem:[%s4061_s5 + $0x40] sm:$0xff] }
 0x715   : > { %v1386_v47 = vmul.f32 %v1987_v15, %v1385_v13  ;;  %v1398_v2 = vmul.f32 %v1376_v33, %v1213_v26  ;;  %v1705_v26 = vld [vmem:[%s4061_s5 + $0x50] sm:$0xff]  ;;  %v1704_v13 = vld [vmem:[%s4061_s5 + $0x48] sm:$0xff] }
 0x717   : > { %v1387_v7 = vadd.f32 %v1987_v15, %v1386_v47  ;;  %v1399_v49 = vadd.f32 %v1398_v2, %v1356_v29  ;;  %v1708_v2 = vld [vmem:[%s4061_s5 + $0x68] sm:$0xff] }
 0x719   : > { %v1391_v53 = vsel %vm1390_vm10, %v1987_v15, %v1387_v7  ;;  %1988 = vtanh.f32 %v1399_v49  ;;  %v1707_v15 = vld [vmem:[%s4061_s5 + $0x60] sm:$0xff] }
 0x71a   : > { %v1396_v9 = vsel %vm1393_vm11, %v1395_v24, %v1391_v53  ;;  %v4463_v24 = vld [vmem:[#allocation4_spill] sm:$0xff] }
 0x71b   : > { %v1401_v32 = vsub.f32 1.0, %v1396_v9  ;;  %v1403_v20 = vmul.f32 %v1396_v9, %v3412_v43  ;;  %v2112_v43 = vld [vmem:[%s4059_s3 + $0xe8] sm:$0xff] }
 0x71f   : > { %v1989_v57 = vpop.eup %1988 }
 0x720   : > { %v1402_v63 = vmul.f32 %v1989_v57, %v1401_v32  ;;  %v4464_v32 = vld [vmem:[#allocation3_spill] sm:$0xff] }
 0x722   : > { %v3850_v61 = vadd.f32 %v1403_v20, %v1402_v63  ;;  %v4465_v63 = vld [vmem:[#allocation5_spill] sm:$0xff] }
 0x724   : > { %1421 = vmatmul.f32.vlgmr.msra.gmra.mxu0 %v3850_v61  ;;  %1441 = vmatmul.f32.vlgmr.msrb.gmra.mxu1 %v3850_v61 }
 0x725   : > { %1461 = vmatmul.f32.vlgmr.msrb.gmra.mxu2 %v3850_v61  ;;  %1481 = vmatmul.f32.vlgmr.msrb.gmra.mxu3 %v3850_v61 }
 0x726   : > { %1588 = vmatpush.msra.mxu0 %v3492_v17  ;;  %v2113_v17 = vld [vmem:[%s4059_s3 + $0xa8] sm:$0xff] }
 0x728   : > { %1589 = vmatpush.msra.mxu0 %v3504_v6  ;;  %v2114_v6 = vld [vmem:[%s4059_s3 + $0x68] sm:$0xff] }
 0x72a   : > { %1590 = vmatpush.msra.mxu0 %v3516_v10  ;;  %v2115_v10 = vld [vmem:[%s4059_s3 + $0x28] sm:$0xff] }
 0x72c   : > { %1501 = vmatmul.f32.vlgmr.msrb.gmra.mxu0 %v3850_v61 }
 0x72d   : > { %1591 = vmatpush.msra.mxu0 %v3528_v14 }
 0x72f   : > { %1592 = vmatpush.msra.mxu0 %v3544_v22 }
 0x731   : > { %1593 = vmatpush.msra.mxu0 %v3556_v25 }
 0x733   : > { %1594 = vmatpush.msra.mxu0 %v3568_v31 }
 0x735   : > { %1595 = vmatpush.msra.mxu0 %v3580_v5 }
 0x737   : > { %1596 = vmatpush.msra.mxu0 %v3592_v3 }
 0x739   : > { %1597 = vmatpush.msra.mxu0 %v3604_v45 }
 0x73b   : > { %1598 = vmatpush.msra.mxu0 %v3616_v54 }
 0x73d   : > { %1599 = vmatpush.msra.mxu0 %v3628_v11 }
 0x73f   : > { %1600 = vmatpush.msra.mxu0 %v2112_v43  ;;  %v1702_v43 = vld [vmem:[%s4061_s5 + $0x38] sm:$0xff] }
 0x741   : > { %1601 = vmatpush.msra.mxu0 %v2113_v17 }
 0x743   : > { %1602 = vmatpush.msra.mxu0 %v2114_v6 }
 0x745   : > { %1603 = vmatpush.msra.mxu0 %v2115_v10  ;;  %v1701_v10 = vld [vmem:[%s4061_s5 + $0x30] sm:$0xff] }
 0x7a1   : > { %v1422_v14 = vpop.f32.mrf.mxu0  ;;  %v1442_v22 = vpop.f32.mrf.mxu1 }
 0x7a2   : > { %v1423_v25 = vadd.f32 %v1422_v14, %v4331_v42  ;;  %v1443_v31 = vadd.f32 %v1442_v22, %v4332_v58  ;;  %v4453_v42 = vld [vmem:[#allocation34_spill] sm:$0xff] }
 0x7a3   : > { %v4454_v58 = vld [vmem:[#allocation50_spill] sm:$0xff] }
 0x7a4   : > { %1520 = vmatpush.msra.mxu1 %v1443_v31  ;;  %1543 = vmatpush.msra.mxu2 %v1423_v25  ;;  %v1700_v25 = vld [vmem:[%s4061_s5 + $0x28] sm:$0xff]  ;;  %v1699_v31 = vld [vmem:[%s4061_s5 + $0x20] sm:$0xff] }
 0x7a5   : > { %1915 = vmatmul.msk.f32.vlgmr.msra.gmra.mxu1 %vm617_vm2, %v4333_v62  ;;  %1917 = vmatmul.msk.f32.vlgmr.msra.gmra.mxu2 %vm617_vm2, %v4334_v59  ;;  %v4455_v62 = vld [vmem:[#allocation49_spill] sm:$0xff]  ;;  %v4456_v59 = vld [vmem:[#allocation51_spill] sm:$0xff] }
 0x7a6   : > { %1608 = vmatpush.msrb.mxu1 %v3498_v4  ;;  %1628 = vmatpush.msrb.mxu2 %v3711_v40  ;;  %v2117_v4 = vld [vmem:[%s4059_s3 + $0xb0] sm:$0xff] }
 0x7a8   : > { %1609 = vmatpush.msrb.mxu1 %v3510_v8  ;;  %1629 = vmatpush.msrb.mxu2 %v3717_v0  ;;  %v4458_v8 = vld [vmem:[#allocation53_spill] sm:$0xff] }
 0x7a9   : > { %v1502_v21 = vpop.f32.mrf.mxu0 }
 0x7aa   : > { %1610 = vmatpush.msrb.mxu1 %v3522_v12  ;;  %1630 = vmatpush.msrb.mxu2 %v3723_v38  ;;  %v2118_v12 = vld [vmem:[%s4059_s3 + $0x70] sm:$0xff] }
 0x7ac   : > { %1611 = vmatpush.msrb.mxu1 %v3534_v19  ;;  %1631 = vmatpush.msrb.mxu2 %v3729_v37  ;;  %v4459_v19 = vld [vmem:[#allocation54_spill] sm:$0xff] }
 0x7ad   : > { %1916 = vmatmul.msk.f32.gmra.mxu1 %vm617_vm2, %v4343_v36  ;;  %1918 = vmatmul.msk.f32.gmra.mxu2 %vm617_vm2, %v4344_v39  ;;  %v2116_v36 = vld [vmem:[%s4059_s3 + $0xf0] sm:$0xff] }
 0x7ae   : > { %1612 = vmatpush.msrb.mxu1 %v3550_v23  ;;  %1632 = vmatpush.msrb.mxu2 %v3735_v55  ;;  %v4457_v39 = vld [vmem:[#allocation52_spill] sm:$0xff] }
 0x7af   : > { %v2119_v23 = vld [vmem:[%s4059_s3 + $0x30] sm:$0xff] }
 0x7b0   : > { %1613 = vmatpush.msrb.mxu1 %v3562_v27  ;;  %1633 = vmatpush.msrb.mxu2 %v3741_v16  ;;  %v4460_v27 = vld [vmem:[#allocation55_spill] sm:$0xff] }
 0x7b2   : > { %1614 = vmatpush.msrb.mxu1 %v3574_v30  ;;  %1634 = vmatpush.msrb.mxu2 %v3747_v60  ;;  %v1462_v30 = vpop.f32.mrf.mxu2 }
 0x7b3   : > { %v1463_v53 = vadd.f32 %v1462_v30, %v4462_v34  ;;  %v1751_v34 = vld [vmem:[%s4062_s6 + $0x28] sm:$0xff] }
 0x7b4   : > { %1615 = vmatpush.msrb.mxu1 %v3586_v46  ;;  %1635 = vmatpush.msrb.mxu2 %v3753_v56 }
 0x7b6   : > { %1616 = vmatpush.msrb.mxu1 %v3598_v41  ;;  %1636 = vmatpush.msrb.mxu2 %v3759_v35  ;;  %v4461_v35 = vld [vmem:[#allocation70_spill] sm:$0xff] }
 0x7b8   : > { %1617 = vmatpush.msrb.mxu1 %v3610_v51  ;;  %1637 = vmatpush.msrb.mxu2 %v3765_v52  ;;  %v1482_v52 = vpop.f32.mrf.mxu3 }
 0x7b9   : > { %v1483_v9 = vadd.f32 %v1482_v52, %v4463_v24  ;;  %v1749_v24 = vld [vmem:[%s4062_s6 + $0x18] sm:$0xff] }
 0x7ba   : > { %1618 = vmatpush.msrb.mxu1 %v4453_v42  ;;  %1638 = vmatpush.msrb.mxu2 %v4454_v58  ;;  %v1698_v42 = vld [vmem:[%s4061_s5 + $0x18] sm:$0xff]  ;;  %v1697_v58 = vld [vmem:[%s4061_s5 + $0x10] sm:$0xff] }
 0x7bc   : > { %1619 = vmatpush.msrb.mxu1 %v4455_v62  ;;  %1639 = vmatpush.msrb.mxu2 %v4456_v59  ;;  %v1696_v62 = vld [vmem:[%s4061_s5 + $0x8] sm:$0xff] }
 0x7be   : > { %1620 = vmatpush.msrb.mxu1 %v2116_v36  ;;  %1640 = vmatpush.msrb.mxu2 %v4457_v39  ;;  %v1695_v36 = vld [vmem:[%s4061_s5] sm:$0xff] }
 0x7c0   : > { %1621 = vmatpush.msrb.mxu1 %v2117_v4  ;;  %1641 = vmatpush.msrb.mxu2 %v4458_v8 }
 0x7c2   : > { %1622 = vmatpush.msrb.mxu1 %v2118_v12  ;;  %1642 = vmatpush.msrb.mxu2 %v4459_v19 }
 0x7c4   : > { %1623 = vmatpush.msrb.mxu1 %v2119_v23  ;;  %1643 = vmatpush.msrb.mxu2 %v4460_v27 }
 0x822   : > { %v1522_v5 = vpop.f32.mrf.mxu1 }
 0x828   : > { %v1545_v46 = vpop.f32.mrf.mxu2 }
 0x829   : > { %v1546_v3 = vadd.f32 %v1545_v46, %v1522_v5 }
 0x82a   : > { %v1525_v45 = vpop.f32.mrf.mxu1 }
 0x82b   : > { %v1553_v41 = vmul.f32 1.442695, %v1546_v3  ;;  %vm1551_vm2 = vcmp.gt.f32.partialorder %v1546_v3, 0.0 }
 0x82d   : > { %1990 = vpow2.f32 %v1553_v41 }
 0x830   : > { %v1548_v51 = vpop.f32.mrf.mxu2 }
 0x831   : > { %v1549_v54 = vadd.f32 %v1548_v51, %v1525_v45 }
 0x833   : > { %v1555_v49 = vmul.f32 1.442695, %v1549_v54  ;;  %v1991_v11 = vpop.eup %1990  ;;  %vm1552_vm12 = vcmp.gt.f32.partialorder %v1549_v54, 0.0 }
 0x834   : > { %v1919_v47 = vadd.f32 -1.0, %v1991_v11  ;;  %v1503_v11 = vadd.f32 %v1502_v21, %v3127_v50  ;;  %v1759_v21 = vld [vmem:[%s4062_s6 + $0x68] sm:$0xff] }
 0x835   : > { %1992 = vpow2.f32 %v1555_v49 }
 0x836   : > { %v1559_v0 = vmul.f32 1.6732632, %v1919_v47 }
 0x838   : > { %v1561_v16 = vsel %vm1551_vm2, %v1546_v3, %v1559_v0 }
 0x839   : > { %v1563_v56 = vmul.f32 1.050701, %v1561_v16 }
 0x83b   : > { %v1993_v40 = vpop.eup %1992 }
 0x83c   : > { %v1920_v38 = vadd.f32 -1.0, %v1993_v40 }
 0x83e   : > { %v1560_v37 = vmul.f32 1.6732632, %v1920_v38 }
 0x840   : > { %v1562_v55 = vsel %vm1552_vm12, %v1549_v54, %v1560_v37 }
 0x841   : > { %v1564_v60 = vmul.f32 1.050701, %v1562_v55 }
 0x843   : > { %1921 = vmatpush.msk.msra.mxu3 %vm694_vm7, %v1564_v60 }
 0x845   : > { %1583 = vmatpush.msra.mxu3 %v1563_v56 }
 0x846   : > { %1922 = vmatmul.msk.f32.vlgmr.msra.gmra.mxu3 %vm690_vm9, %v4461_v35 }
 0x847   : > { %1711 = vmatpush.msrb.mxu3 %v1710_v28 }
 0x849   : > { %1712 = vmatpush.msrb.mxu3 %v1709_v48 }
 0x84b   : > { %1713 = vmatpush.msrb.mxu3 %v1708_v2 }
 0x84d   : > { %1714 = vmatpush.msrb.mxu3 %v1707_v15  ;;  %v1760_v15 = vld [vmem:[%s4062_s6 + $0x70] sm:$0xff] }
 0x84f   : > { %1715 = vmatpush.msrb.mxu3 %v1706_v1  ;;  %v1757_v1 = vld [vmem:[%s4062_s6 + $0x58] sm:$0xff] }
 0x851   : > { %1716 = vmatpush.msrb.mxu3 %v1705_v26  ;;  %v1756_v26 = vld [vmem:[%s4062_s6 + $0x50] sm:$0xff] }
 0x853   : > { %1717 = vmatpush.msrb.mxu3 %v1704_v13  ;;  %v1755_v13 = vld [vmem:[%s4062_s6 + $0x48] sm:$0xff] }
 0x855   : > { %1718 = vmatpush.msrb.mxu3 %v1703_v18  ;;  %v1754_v18 = vld [vmem:[%s4062_s6 + $0x40] sm:$0xff] }
 0x857   : > { %1719 = vmatpush.msrb.mxu3 %v1702_v43 }
 0x859   : > { %1720 = vmatpush.msrb.mxu3 %v1701_v10 }
 0x85b   : > { %1721 = vmatpush.msrb.mxu3 %v1700_v25 }
 0x85d   : > { %1722 = vmatpush.msrb.mxu3 %v1699_v31 }
 0x85f   : > { %1723 = vmatpush.msrb.mxu3 %v1698_v42 }
 0x861   : > { %1724 = vmatpush.msrb.mxu3 %v1697_v58 }
 0x863   : > { %1725 = vmatpush.msrb.mxu3 %v1696_v62 }
 0x865   : > { %1726 = vmatpush.msrb.mxu3 %v1695_v36 }
 0x8c9   : > { %v1585_v7 = vpop.f32.mrf.mxu3 }
 0x8ca   : > { %1604 = vmatmul.f32.vlgmr.msra.gmra.mxu0 %v1585_v7  ;;  %1624 = vmatmul.f32.vlgmr.msrb.gmra.mxu1 %v1585_v7 }
 0x8cb   : > { %1644 = vmatmul.f32.vlgmr.msrb.gmra.mxu2 %v1585_v7 }
 0x947   : > { %v1605_v29 = vpop.f32.mrf.mxu0  ;;  %v1625_v33 = vpop.f32.mrf.mxu1 }
 0x948   : > { %v1606_v57 = vadd.f32 %v1605_v29, %v4464_v32  ;;  %v1626_v20 = vadd.f32 %v1625_v33, %v4465_v63  ;;  %v1753_v29 = vld [vmem:[%s4062_s6 + $0x38] sm:$0xff]  ;;  %v1752_v33 = vld [vmem:[%s4062_s6 + $0x30] sm:$0xff]  ;;  %v1747_v32 = vld [vmem:[%s4062_s6 + $0x8] sm:$0xff] }
 0x94a   : > { %v1648_v17 = vadd.f32 %v1606_v57, %v1463_v53  ;;  %v1668_v6 = vadd.f32 %v1626_v20, %v1483_v9  ;;  %v1750_v53 = vld [vmem:[%s4062_s6 + $0x20] sm:$0xff]  ;;  %v1748_v9 = vld [vmem:[%s4062_s6 + $0x10] sm:$0xff] }
 0x94b   : > { %v1746_v57 = vld [vmem:[%s4062_s6] sm:$0xff] }
 0x94c   : > { %v1923_v14 = vmul.f32 -1.442695, %v1648_v17  ;;  %v1924_v22 = vmul.f32 -1.442695, %v1668_v6 }
 0x94e   : > { %1994 = vpow2.f32 %v1923_v14  ;;  %v1645_v54 = vpop.f32.mrf.mxu2  ;;  %v1737_v14 = vld [vmem:[%s4063_s7] sm:$0x1] }
 0x94f   : > { %1996 = vpow2.f32 %v1924_v22  ;;  %v1646_v38 = vadd.f32 %v1645_v54, %v3129_v44  ;;  %v1761_v44 = vld [vmem:[%s4062_s6 + $0x78] sm:$0xff] }
 0x950   : > { %1763 = vmatpush.msrb.mxu0 %v1761_v44 }
 0x952   : > { %1764 = vmatpush.msrb.mxu0 %v1760_v15 }
 0x954   : > { %v1995_v59 = vpop.eup %1994  ;;  %1765 = vmatpush.msrb.mxu0 %v1759_v21 }
 0x955   : > { %v1997_v39 = vpop.eup %1996  ;;  %v1652_v4 = vadd.f32 1.0, %v1995_v59 }
 0x956   : > { %v1672_v8 = vadd.f32 1.0, %v1997_v39  ;;  %v1762_v39 = vld [vmem:[%s4063_s7 + $0x1] sm:$0x1] }
 0x957   : > { %1998 = vrcp.f32 %v1652_v4  ;;  %v1664_v46 = vand.u32 2147483648, %v1652_v4  ;;  %v1662_v41 = vand.u32 2147483647, %v1652_v4  ;;  %vm1658_vm9 = vweird.f32 %v1652_v4 }
 0x958   : > { %2000 = vrcp.f32 %v1672_v8  ;;  %v1684_v55 = vand.u32 2147483648, %v1672_v8  ;;  %vm1678_vm0 = vweird.f32 %v1672_v8  ;;  %v1682_v16 = vand.u32 2147483647, %v1672_v8 }
 0x959   : > { %v1665_v49 = vor.u32 1.1754944e-38, %v1664_v46  ;;  %vm1663_vm14 = vcmp.eq.f32.partialorder %v1662_v41, 8.507059e+37 }
 0x95a   : > { %v1685_v35 = vor.u32 1.1754944e-38, %v1684_v55  ;;  %vm1683_vm3 = vcmp.eq.f32.partialorder %v1682_v16, 8.507059e+37 }
 0x95d   : > { %v1999_v12 = vpop.eup %1998 }
 0x95e   : > { %v2001_v19 = vpop.eup %2000  ;;  %v1654_v23 = vmul.f32 %v1999_v12, %v1652_v4  ;;  %vm1659_vm7 = vweird.f32 %v1999_v12 }
 0x95f   : > { %v1674_v27 = vmul.f32 %v2001_v19, %v1672_v8  ;;  %vm1660_vm13 = vmor %vm1658_vm9, %vm1659_vm7  ;;  %vm1679_vm15 = vweird.f32 %v2001_v19 }
 0x960   : > { %v1655_v30 = vsub.f32 1.0, %v1654_v23  ;;  %vm1680_vm1 = vmor %vm1678_vm0, %vm1679_vm15 }
 0x961   : > { %v1675_v5 = vsub.f32 1.0, %v1674_v27 }
 0x962   : > { %v1656_v3 = vmul.f32 %v1999_v12, %v1655_v30 }
 0x963   : > { %v1676_v45 = vmul.f32 %v2001_v19, %v1675_v5  ;;  %v1790_v5 = vld [vmem:[%s4063_s7 + $0x2] sm:$0x1] }
 0x964   : > { %v1657_v51 = vadd.f32 %v1999_v12, %v1656_v3 }
 0x965   : > { %v1677_v0 = vadd.f32 %v2001_v19, %v1676_v45  ;;  %v1791_v45 = vld [vmem:[%s4063_s7 + $0x3] sm:$0x1] }
 0x966   : > { %v1661_v47 = vsel %vm1660_vm13, %v1999_v12, %v1657_v51 }
 0x967   : > { %v1666_v40 = vsel %vm1663_vm14, %v1665_v49, %v1661_v47  ;;  %v1681_v56 = vsel %vm1680_vm1, %v2001_v19, %v1677_v0 }
 0x968   : > { %v1688_v37 = vmul.f32 %v1666_v40, %v1503_v11  ;;  %v1686_v52 = vsel %vm1683_vm3, %v1685_v35, %v1681_v56 }
 0x969   : > { %v1691_v7 = vsub.f32 1.0, %v1686_v52  ;;  %v1693_v48 = vmul.f32 %v1686_v52, %v3850_v61  ;;  %v1758_v61 = vld [vmem:[%s4062_s6 + $0x60] sm:$0xff] }
 0x96a   : > { %v1689_v60 = vadd.f32 %v1688_v37, %v1646_v38  ;;  %1766 = vmatpush.msrb.mxu0 %v1758_v61 }
 0x96c   : > { %2002 = vtanh.f32 %v1689_v60  ;;  %1767 = vmatpush.msrb.mxu0 %v1757_v1 }
 0x96e   : > { %1768 = vmatpush.msrb.mxu0 %v1756_v26 }
 0x970   : > { %1769 = vmatpush.msrb.mxu0 %v1755_v13 }
 0x972   : > { %v2003_v50 = vpop.eup %2002  ;;  %1770 = vmatpush.msrb.mxu0 %v1754_v18 }
 0x973   : > { %v1692_v28 = vmul.f32 %v2003_v50, %v1691_v7 }
 0x974   : > { %1771 = vmatpush.msrb.mxu0 %v1753_v29 }
 0x975   : > { %v1694_v2 = vadd.f32 %v1693_v48, %v1692_v28 }
 0x976   : > { %1772 = vmatpush.msrb.mxu0 %v1752_v33 }
 0x977   : > { %1727 = vmatmul.f32.vlgmr.msrb.gmra.mxu3 %v1694_v2 }
 0x978   : > { %1773 = vmatpush.msrb.mxu0 %v1751_v34 }
 0x97a   : > { %1774 = vmatpush.msrb.mxu0 %v1750_v53 }
 0x97c   : > { %1775 = vmatpush.msrb.mxu0 %v1749_v24 }
 0x97e   : > { %1776 = vmatpush.msrb.mxu0 %v1748_v9 }
 0x980   : > { %1777 = vmatpush.msrb.mxu0 %v1747_v32 }
 0x982   : > { %1778 = vmatpush.msrb.mxu0 %v1746_v57 }
 0x9fa   : > { %v1728_v63 = vpop.f32.mrf.mxu3 }
 0x9fb   : > { %v1731_v20 = vrot.slane %v1728_v63, 4 }
 0x9fd   : > { %v1732_v43 = vadd.f32 %v1731_v20, %v1728_v63 }
 0x9ff   : > { %v1733_v17 = vrot.slane %v1732_v43, 2 }
 0xa01   : > { %v1734_v6 = vadd.f32 %v1733_v17, %v1732_v43 }
 0xa03   : > { %v1735_v10 = vrot.slane %v1734_v6, 1 }
 0xa05   : > { %v1736_v22 = vadd.f32 %v1735_v10, %v1734_v6 }
 0xa07   : > { %v1738_v25 = vadd.f32 %v1737_v14, %v1736_v22 }
 0xa09   : > { %v1740_v31 = vmul.f32 1.442695, %v1738_v25  ;;  %vm1739_vm4 = vcmp.gt.f32.partialorder %v1738_v25, 0.0 }
 0xa0b   : > { %2004 = vpow2.f32 %v1740_v31 }
 0xa11   : > { %v2005_v42 = vpop.eup %2004 }
 0xa12   : > { %v1925_v58 = vadd.f32 -1.0, %v2005_v42 }
 0xa14   : > { %v1743_v62 = vmul.f32 1.6732632, %v1925_v58 }
 0xa16   : > { %v1744_v59 = vsel %vm1739_vm4, %v1738_v25, %v1743_v62 }
 0xa17   : > { %v1745_v36 = vmul.f32 1.050701, %v1744_v59 }
 0xa19   : > { %1779 = vmatmul.f32.vlgmr.msrb.gmra.mxu0 %v1745_v36 }
 0xa96   : > { %v1780_v4 = vpop.f32.mrf.mxu0 }
 0xa97   : > { %v1781_v8 = vadd.f32 %v1780_v4, %v1762_v39 }
 0xa99   : > { %v1784_v12 = vmul.f32 1.442695, %v1781_v8  ;;  %vm1783_vm5 = vcmp.gt.f32.partialorder %v1781_v8, 0.0 }
 0xa9b   : > { %2006 = vpow2.f32 %v1784_v12 }
 0xaa1   : > { %v2007_v19 = vpop.eup %2006 }
 0xaa2   : > { %v1926_v23 = vadd.f32 -1.0, %v2007_v19 }
 0xaa4   : > { %v1787_v27 = vmul.f32 1.6732632, %v1926_v23 }
 0xaa6   : > { %v1788_v30 = vsel %vm1783_vm5, %v1781_v8, %v1787_v27 }
 0xaa7   : > { %v1789_v46 = vmul.f32 1.050701, %v1788_v30 }
 0xaa9   : > { %v1792_v3 = vmul.f32 %v1790_v5, %v1789_v46 }
 0xaab   : > { %v1794_v41 = vsel %vm1793_vm6, %v1792_v3, 0.0 }
 0xaac   : > { %1795 = vadd.xlane.f32.xlu2 %v1794_v41 }
 0xb1f   : > { %v1796_v51 = vpop.xlane.xlu2 %1795 }
 0xb20   : > { %v1797_v54 = vadd.f32 %v1796_v51, %v1791_v45 }
 0xb22   : > { %1800 = vperm.xlu2 %1945, %v1797_v54  }
 0xb7c   : > { %v1801_v49 = vpop.permute.xlu2 %1800 }
 0xb7d   : > { %1803 = vst [vmem:[%s332_s20] sm:$0x1] %v1801_v49 }
 0xb7e PF: > { %s18_s27 = sadd.s32 1, %s2126_s27  }
 0xb7f   : > { %p15_p4 = scmp.ge.s32.totalorder %s18_s27, 6  }
 0xb81   :  { %17 = sbr.rel (!%p15_p4) target bundleno = 1 (0x1), region = 88 }

</bundles_post_ra>
